<compile_context>
chip_gen: v5e
topology: v5e:2x2
jax: 0.10.0
libtpu: 0.0.40
codegen_flags: <defaults>
</compile_context>

<pallas_src>
import math

import jax
import jax.numpy as jnp
from jax.experimental import pallas as pl
from jax.experimental.pallas import tpu as pltpu


# --------------------------------------------------------------------------- kernel
def fused_transt_forward_kernel(patches, bb_w, wq, wkv, rel_bias, wo, w1, w2,
                                hw1, hw2, hw3, vecs, *, Nz, Nx, D, H):
    """Backbone matmul + relative-position cross-attention transformer + heads.
    grid=(B,): one batch element per grid step (megacore-parallel on v7x);
    all weights are resident in VMEM across steps."""
    B = patches.shape[0]
    KK = patches.shape[2]
    Dh = D // H
    FFN = w1.shape[1]
    n_out = hw3.shape[1]
    scale = 1.0 / math.sqrt(Dh)
    eps = 1e-5

    def kernel(pt_ref, bbw_ref, wq_ref, wkv_ref, bias_ref, wo_ref, w1_ref,
               w2_ref, hw1_ref, hw2_ref, hw3_ref, vec_ref, o_ref):
        f32 = jnp.float32
        vec = vec_ref[...]                                   # (13, 128) packed biases
        vrow = lambda r, n: vec[r:r + 1, :n]                 # (1, n) broadcast row

        def layernorm(xv, g, b):
            mu = jnp.mean(xv, axis=-1, keepdims=True)
            var = jnp.mean((xv - mu) ** 2, axis=-1, keepdims=True)
            return (xv - mu) * jax.lax.rsqrt(var + eps) * g + b

        # ---- backbone conv (im2col matmul + ReLU); template+search rows stacked
        feat = jnp.dot(pt_ref[...], bbw_ref[...], preferred_element_type=f32)
        feat = jnp.maximum(feat + vrow(0, D), 0.0)           # (Nz+Nx, D)
        z_feat = feat[:Nz]                                   # (Nz, D)
        x_feat = feat[Nz:]                                   # (Nx, D)

        # ---- projections: Q from search tokens (scale folded in), fused K|V
        q = (jnp.dot(x_feat, wq_ref[...], preferred_element_type=f32)
             + vrow(1, D)) * scale
        kv = jnp.dot(z_feat, wkv_ref[...], preferred_element_type=f32) + vrow(2, 2 * D)
        k = kv[:, :D]
        v = kv[:, D:]
        bias_all = bias_ref[...]                             # (H*Nx, Nz)

        # ---- relative-position cross attention; out-projection folded per head:
        #   concat_h(o_h) @ wo == sum_h o_h @ wo[h*Dh:(h+1)*Dh, :]
        ob = jnp.zeros((Nx, D), f32)
        for hh in range(H):
            qh = q[:, hh * Dh:(hh + 1) * Dh]
            kh = k[:, hh * Dh:(hh + 1) * Dh]
            vh = v[:, hh * Dh:(hh + 1) * Dh]
            s = jax.lax.dot_general(qh, kh, (((1,), (1,)), ((), ())),
                                    preferred_element_type=f32)      # (Nx, Nz)
            s = s + bias_all[hh * Nx:(hh + 1) * Nx, :]
            m = jnp.max(s, axis=-1, keepdims=True)
            p = jnp.exp(s - m)
            denom = jnp.sum(p, axis=-1, keepdims=True)
            p = p * pl.reciprocal(denom, approx=True)        # EUP, not VALU divide
            head_o = jnp.dot(p, vh, preferred_element_type=f32)       # (Nx, Dh)
            ob = ob + jnp.dot(head_o, wo_ref[hh * Dh:(hh + 1) * Dh, :],
                              preferred_element_type=f32)
        attn = ob + vrow(3, D)                               # (Nx, D)

        # ---- residual + LN1
        h = layernorm(x_feat + attn, vrow(4, D), vrow(5, D))

        # ---- FFN + residual + LN2
        f = jnp.dot(h, w1_ref[...], preferred_element_type=f32) + vrow(6, FFN)
        f = jnp.maximum(f, 0.0)
        f = jnp.dot(f, w2_ref[...], preferred_element_type=f32) + vrow(7, D)
        h = layernorm(h + f, vrow(8, D), vrow(9, D))

        # ---- fused classification + regression heads (block-diagonal weights)
        y = jnp.dot(h, hw1_ref[...], preferred_element_type=f32) + vrow(10, 2 * D)
        y = jnp.maximum(y, 0.0)
        y = jnp.dot(y, hw2_ref[...], preferred_element_type=f32) + vrow(11, 2 * D)
        y = jnp.maximum(y, 0.0)
        y = jnp.dot(y, hw3_ref[...], preferred_element_type=f32) + vrow(12, n_out)
        # cols 0:2 = class logits (identity), cols 2:6 = box regression (sigmoid)
        col = jax.lax.broadcasted_iota(jnp.int32, y.shape, 1)
        o_ref[...] = jnp.where(col < 2, y, jax.nn.sigmoid(y)).astype(o_ref.dtype)

    full2d = lambda a: pl.BlockSpec(a.shape, lambda b: (0, 0))
    in_specs = [
        pl.BlockSpec((None, Nz + Nx, KK), lambda b: (b, 0, 0)),   # per-batch patches
        full2d(bb_w), full2d(wq), full2d(wkv), full2d(rel_bias), full2d(wo),
        full2d(w1), full2d(w2), full2d(hw1), full2d(hw2), full2d(hw3),
        full2d(vecs),
    ]
    return pl.pallas_call(
        kernel,
        out_shape=jax.ShapeDtypeStruct((B, Nx, n_out), jnp.float32),
        grid=(B,),
        in_specs=in_specs,
        out_specs=pl.BlockSpec((None, Nx, n_out), lambda b: (b, 0, 0)),
        compiler_params=pltpu.CompilerParams(dimension_semantics=("parallel",)),
    )(patches, bb_w, wq, wkv, rel_bias, wo, w1, w2, hw1, hw2, hw3, vecs)


# --------------------------------------------------------------------------- glue
def im2col(x_nchw, k=3, s=2, p=1):
    """NCHW conv input -> (B, Ho*Wo, C*k*k) patches, (C, kh, kw) feature ordering."""
    B, C, H, W = x_nchw.shape
    xp = jnp.pad(x_nchw, ((0, 0), (0, 0), (p, p), (p, p)))
    Ho = (H + 2 * p - k) // s + 1
    Wo = (W + 2 * p - k) // s + 1
    cols = []
    for ki in range(k):
        for kj in range(k):
            cols.append(xp[:, :, ki:ki + s * Ho:s, kj:kj + s * Wo:s])  # (B,C,Ho,Wo)
    patches = jnp.stack(cols, axis=2)                                  # (B,C,k*k,Ho,Wo)
    patches = patches.transpose(0, 3, 4, 1, 2).reshape(B, Ho * Wo, C * k * k)
    return patches, Ho, Wo


def build_rel_bias(rel_table, Hx, Wx, Hz, Wz):
    """rel_table:(heads, (Hx+Hz-1)*(Wx+Wz-1)) -> dense bias (heads, Nx, Nz)."""
    cx = jnp.stack(jnp.meshgrid(jnp.arange(Hx), jnp.arange(Wx), indexing="ij"),
                   axis=-1).reshape(-1, 2)
    cz = jnp.stack(jnp.meshgrid(jnp.arange(Hz), jnp.arange(Wz), indexing="ij"),
                   axis=-1).reshape(-1, 2)
    dh = cx[:, None, 0] - cz[None, :, 0] + (Hz - 1)
    dw = cx[:, None, 1] - cz[None, :, 1] + (Wz - 1)
    idx = dh * (Wx + Wz - 1) + dw                    # (Nx, Nz)
    return rel_table[:, idx]                         # (heads, Nx, Nz)


def pack_bias_rows(vectors, lanes=128):
    """Stack 1-D vectors into one lane-padded (n_rows, lanes) f32 array (1 DMA)."""
    rows = []
    for v in vectors:
        v = jnp.asarray(v, jnp.float32).reshape(-1)
        assert v.shape[0] <= lanes
        rows.append(jnp.pad(v, (0, lanes - v.shape[0])))
    return jnp.stack(rows, axis=0)


# --------------------------------------------------------------------------- params
def init_params(key, cin=4, dim=32, heads=2, ffn=64, hx=8, wx=8, hz=4, wz=4):
    keys = jax.random.split(key, 24)
    s = 0.02
    n = lambda i, shape: (s * jax.random.normal(keys[i], shape)).astype(jnp.float32)
    z = lambda shape: jnp.zeros(shape, jnp.float32)
    o = lambda shape: jnp.ones(shape, jnp.float32)
    table_len = (hx + hz - 1) * (wx + wz - 1)
    return dict(
        bb_w=n(0, (cin * 9, dim)), bb_b=z((dim,)),                     # backbone conv
        wq=n(1, (dim, dim)), bq=z((dim,)),
        wk=n(2, (dim, dim)), bk=z((dim,)),
        wv=n(3, (dim, dim)), bv=z((dim,)),
        wo=n(4, (dim, dim)), bo=z((dim,)),
        rel_table=n(5, (heads, table_len)),
        ln1_g=o((dim,)), ln1_b=z((dim,)),
        w1=n(6, (dim, ffn)), b1=z((ffn,)),
        w2=n(7, (ffn, dim)), b2=z((dim,)),
        ln2_g=o((dim,)), ln2_b=z((dim,)),
        c1_w=n(8, (dim, dim)), c1_b=z((dim,)),
        c2_w=n(9, (dim, dim)), c2_b=z((dim,)),
        c3_w=n(10, (dim, 2)), c3_b=z((2,)),
        r1_w=n(11, (dim, dim)), r1_b=z((dim,)),
        r2_w=n(12, (dim, dim)), r2_b=z((dim,)),
        r3_w=n(13, (dim, 4)), r3_b=z((4,)),
    )


# --------------------------------------------------------------------------- forward
def relative_position_transt_forward(params, z, x, dim=32, heads=2):
    B = z.shape[0]

    # Backbone patches (im2col). Template + search share the conv weights, so
    # their per-batch rows are stacked and pushed through one backbone matmul.
    zp, Hz, Wz = im2col(z)
    xp, Hx, Wx = im2col(x)
    Nz, Nx = Hz * Wz, Hx * Wx
    patches = jnp.concatenate([zp, xp], axis=1).astype(jnp.float32)  # (B, Nz+Nx, C*9)

    # Parameter packing (pure glue): fuse K|V and the cls|reg head layers
    # (block-diagonal so one matmul per layer serves both branches).
    wkv = jnp.concatenate([params["wk"], params["wv"]], axis=1)
    bkv = jnp.concatenate([params["bk"], params["bv"]])
    hw1 = jnp.concatenate([params["c1_w"], params["r1_w"]], axis=1)
    hb1 = jnp.concatenate([params["c1_b"], params["r1_b"]])
    hw2 = jnp.zeros((2 * dim, 2 * dim), jnp.float32)
    hw2 = hw2.at[:dim, :dim].set(params["c2_w"]).at[dim:, dim:].set(params["r2_w"])
    hb2 = jnp.concatenate([params["c2_b"], params["r2_b"]])
    hw3 = jnp.zeros((2 * dim, 6), jnp.float32)
    hw3 = hw3.at[:dim, :2].set(params["c3_w"]).at[dim:, 2:].set(params["r3_w"])
    hb3 = jnp.concatenate([params["c3_b"], params["r3_b"]])

    rel_bias = build_rel_bias(params["rel_table"], Hx, Wx, Hz, Wz)   # (H, Nx, Nz)
    rel_bias2d = rel_bias.reshape(heads * Nx, Nz).astype(jnp.float32)

    # All 1-D bias / affine vectors in ONE lane-padded array (single DMA).
    vecs = pack_bias_rows([params["bb_b"], params["bq"], bkv, params["bo"],
                           params["ln1_g"], params["ln1_b"], params["b1"],
                           params["b2"], params["ln2_g"], params["ln2_b"],
                           hb1, hb2, hb3])

    out = fused_transt_forward_kernel(
        patches, params["bb_w"].astype(jnp.float32), params["wq"].astype(jnp.float32),
        wkv, rel_bias2d, params["wo"].astype(jnp.float32),
        params["w1"].astype(jnp.float32), params["w2"].astype(jnp.float32),
        hw1, hw2, hw3, vecs,
        Nz=Nz, Nx=Nx, D=dim, H=heads)                                # (B, Nx, 6)

    logits = out[..., :2]                                            # (B, Nx, 2)
    boxes = out[..., 2:]                                             # (B, Nx, 4)
    return logits, boxes


# --------------------------------------------------------------------------- main
if __name__ == "__main__":
    B, CIN = 2, 4
    DIM, HEADS = 32, 2
    key = jax.random.PRNGKey(0)
    kz, kx, kp = jax.random.split(key, 3)

    z = jax.random.normal(kz, (B, CIN, 8, 8), dtype=jnp.float32)     # template, NCHW
    x = jax.random.normal(kx, (B, CIN, 16, 16), dtype=jnp.float32)   # search,   NCHW
    params = init_params(kp, cin=CIN, dim=DIM, heads=HEADS,
                         hx=8, wx=8, hz=4, wz=4)

    fwd = jax.jit(relative_position_transt_forward, static_argnames=("dim", "heads"))
    logits, boxes = fwd(params, z, x, dim=DIM, heads=HEADS)
    jax.block_until_ready((logits, boxes))

    assert logits.shape == (B, 64, 2) and boxes.shape == (B, 64, 4)
    assert bool(jnp.all(jnp.isfinite(logits))) and bool(jnp.all(jnp.isfinite(boxes)))
    assert bool(jnp.all((boxes >= 0.0) & (boxes <= 1.0)))
    print("KERNEL_OK")
</pallas_src>

<mosaic_0001>
module attributes {stable_mosaic.version = 11 : i64} {
  func.func @kernel(%arg0: i32, %arg1: memref<1x80x36xf32, #tpu.memory_space<vmem>>, %arg2: memref<36x32xf32, #tpu.memory_space<vmem>>, %arg3: memref<32x32xf32, #tpu.memory_space<vmem>>, %arg4: memref<32x64xf32, #tpu.memory_space<vmem>>, %arg5: memref<128x16xf32, #tpu.memory_space<vmem>>, %arg6: memref<32x32xf32, #tpu.memory_space<vmem>>, %arg7: memref<32x64xf32, #tpu.memory_space<vmem>>, %arg8: memref<64x32xf32, #tpu.memory_space<vmem>>, %arg9: memref<32x64xf32, #tpu.memory_space<vmem>>, %arg10: memref<64x64xf32, #tpu.memory_space<vmem>>, %arg11: memref<64x6xf32, #tpu.memory_space<vmem>>, %arg12: memref<13x128xf32, #tpu.memory_space<vmem>>, %arg13: memref<1x64x6xf32, #tpu.memory_space<vmem>>) attributes {dimension_semantics = [#tpu.dimension_semantics<parallel>], iteration_bounds = array<i64: 2>, scalar_prefetch = 0 : i64, scratch_operands = 0 : i64, tpu.core_type = #tpu.core_type<tc>, window_params = [{transform_indices = @transform_0, window_bounds = array<i64: 1, 80, 36>}, {pipeline_mode = #tpu.pipeline_mode<synchronous>, transform_indices = @transform_1, window_bounds = array<i64: 36, 32>}, {pipeline_mode = #tpu.pipeline_mode<synchronous>, transform_indices = @transform_2, window_bounds = array<i64: 32, 32>}, {pipeline_mode = #tpu.pipeline_mode<synchronous>, transform_indices = @transform_3, window_bounds = array<i64: 32, 64>}, {pipeline_mode = #tpu.pipeline_mode<synchronous>, transform_indices = @transform_4, window_bounds = array<i64: 128, 16>}, {pipeline_mode = #tpu.pipeline_mode<synchronous>, transform_indices = @transform_5, window_bounds = array<i64: 32, 32>}, {pipeline_mode = #tpu.pipeline_mode<synchronous>, transform_indices = @transform_6, window_bounds = array<i64: 32, 64>}, {pipeline_mode = #tpu.pipeline_mode<synchronous>, transform_indices = @transform_7, window_bounds = array<i64: 64, 32>}, {pipeline_mode = #tpu.pipeline_mode<synchronous>, transform_indices = @transform_8, window_bounds = array<i64: 32, 64>}, {pipeline_mode = #tpu.pipeline_mode<synchronous>, transform_indices = @transform_9, window_bounds = array<i64: 64, 64>}, {pipeline_mode = #tpu.pipeline_mode<synchronous>, transform_indices = @transform_10, window_bounds = array<i64: 64, 6>}, {pipeline_mode = #tpu.pipeline_mode<synchronous>, transform_indices = @transform_11, window_bounds = array<i64: 13, 128>}, {transform_indices = @transform_12, window_bounds = array<i64: 1, 64, 6>}]} {
    %c0 = arith.constant 0 : index
    %c0_0 = arith.constant 0 : index
    %0 = vector.load %arg12[%c0, %c0_0] : memref<13x128xf32, #tpu.memory_space<vmem>>, vector<13x128xf32>
    %c0_1 = arith.constant 0 : index
    %c0_2 = arith.constant 0 : index
    %c0_3 = arith.constant 0 : index
    %1 = vector.load %arg1[%c0_1, %c0_2, %c0_3] : memref<1x80x36xf32, #tpu.memory_space<vmem>>, vector<1x80x36xf32>
    %2 = vector.shape_cast %1 : vector<1x80x36xf32> to vector<80x36xf32>
    %c0_4 = arith.constant 0 : index
    %c0_5 = arith.constant 0 : index
    %3 = vector.load %arg2[%c0_4, %c0_5] : memref<36x32xf32, #tpu.memory_space<vmem>>, vector<36x32xf32>
    %cst = arith.constant dense<0.000000e+00> : vector<80x32xf32>
    %4 = tpu.matmul %2, %3, %cst {dimension_numbers = #tpu.dot_dimension_numbers<[1], [0], [0], [1], [0, 0, 1, 1], [], []>} : vector<80x36xf32>, vector<36x32xf32>, vector<80x32xf32> -> vector<80x32xf32>
    %5 = vector.extract_strided_slice %0 {offsets = [0, 0], sizes = [1, 32], strides = [1, 1]} : vector<13x128xf32> to vector<1x32xf32>
    %6 = vector.broadcast %5 : vector<1x32xf32> to vector<80x32xf32>
    %7 = arith.addf %4, %6 : vector<80x32xf32>
    %cst_6 = arith.constant 0.000000e+00 : f32
    %8 = vector.broadcast %cst_6 : f32 to vector<80x32xf32>
    %9 = arith.maximumf %7, %8 : vector<80x32xf32>
    %10 = vector.extract_strided_slice %9 {offsets = [0, 0], sizes = [16, 32], strides = [1, 1]} : vector<80x32xf32> to vector<16x32xf32>
    %11 = vector.extract_strided_slice %9 {offsets = [16, 0], sizes = [64, 32], strides = [1, 1]} : vector<80x32xf32> to vector<64x32xf32>
    %c0_7 = arith.constant 0 : index
    %c0_8 = arith.constant 0 : index
    %12 = vector.load %arg3[%c0_7, %c0_8] : memref<32x32xf32, #tpu.memory_space<vmem>>, vector<32x32xf32>
    %cst_9 = arith.constant dense<0.000000e+00> : vector<64x32xf32>
    %13 = tpu.matmul %11, %12, %cst_9 {dimension_numbers = #tpu.dot_dimension_numbers<[1], [0], [0], [1], [0, 0, 1, 1], [], []>} : vector<64x32xf32>, vector<32x32xf32>, vector<64x32xf32> -> vector<64x32xf32>
    %14 = vector.extract_strided_slice %0 {offsets = [1, 0], sizes = [1, 32], strides = [1, 1]} : vector<13x128xf32> to vector<1x32xf32>
    %15 = vector.broadcast %14 : vector<1x32xf32> to vector<64x32xf32>
    %16 = arith.addf %13, %15 : vector<64x32xf32>
    %cst_10 = arith.constant 2.500000e-01 : f32
    %17 = vector.broadcast %cst_10 : f32 to vector<64x32xf32>
    %18 = arith.mulf %16, %17 : vector<64x32xf32>
    %c0_11 = arith.constant 0 : index
    %c0_12 = arith.constant 0 : index
    %19 = vector.load %arg4[%c0_11, %c0_12] : memref<32x64xf32, #tpu.memory_space<vmem>>, vector<32x64xf32>
    %cst_13 = arith.constant dense<0.000000e+00> : vector<16x64xf32>
    %20 = tpu.matmul %10, %19, %cst_13 {dimension_numbers = #tpu.dot_dimension_numbers<[1], [0], [0], [1], [0, 0, 1, 1], [], []>} : vector<16x32xf32>, vector<32x64xf32>, vector<16x64xf32> -> vector<16x64xf32>
    %21 = vector.extract_strided_slice %0 {offsets = [2, 0], sizes = [1, 64], strides = [1, 1]} : vector<13x128xf32> to vector<1x64xf32>
    %22 = vector.broadcast %21 : vector<1x64xf32> to vector<16x64xf32>
    %23 = arith.addf %20, %22 : vector<16x64xf32>
    %24 = vector.extract_strided_slice %23 {offsets = [0, 0], sizes = [16, 32], strides = [1, 1]} : vector<16x64xf32> to vector<16x32xf32>
    %25 = vector.extract_strided_slice %23 {offsets = [0, 32], sizes = [16, 32], strides = [1, 1]} : vector<16x64xf32> to vector<16x32xf32>
    %c0_14 = arith.constant 0 : index
    %c0_15 = arith.constant 0 : index
    %26 = vector.load %arg5[%c0_14, %c0_15] : memref<128x16xf32, #tpu.memory_space<vmem>>, vector<128x16xf32>
    %cst_16 = arith.constant 0.000000e+00 : f32
    %27 = vector.broadcast %cst_16 : f32 to vector<64x32xf32>
    %28 = vector.extract_strided_slice %18 {offsets = [0, 0], sizes = [64, 16], strides = [1, 1]} : vector<64x32xf32> to vector<64x16xf32>
    %29 = vector.extract_strided_slice %24 {offsets = [0, 0], sizes = [16, 16], strides = [1, 1]} : vector<16x32xf32> to vector<16x16xf32>
    %30 = vector.extract_strided_slice %25 {offsets = [0, 0], sizes = [16, 16], strides = [1, 1]} : vector<16x32xf32> to vector<16x16xf32>
    %cst_17 = arith.constant dense<0.000000e+00> : vector<64x16xf32>
    %31 = tpu.matmul %28, %29, %cst_17 {dimension_numbers = #tpu.dot_dimension_numbers<[1], [1], [0], [0], [0, 0, 1, 0], [], []>} : vector<64x16xf32>, vector<16x16xf32>, vector<64x16xf32> -> vector<64x16xf32>
    %32 = vector.extract_strided_slice %26 {offsets = [0, 0], sizes = [64, 16], strides = [1, 1]} : vector<128x16xf32> to vector<64x16xf32>
    %33 = arith.addf %31, %32 : vector<64x16xf32>
    %cst_18 = arith.constant dense<0xFF800000> : vector<64xf32>
    %34 = vector.multi_reduction <maximumf>, %33, %cst_18 [1] : vector<64x16xf32> to vector<64xf32>
    %35 = vector.shape_cast %34 : vector<64xf32> to vector<64x1xf32>
    %36 = vector.broadcast %35 : vector<64x1xf32> to vector<64x16xf32>
    %37 = arith.subf %33, %36 : vector<64x16xf32>
    %38 = math.exp %37 : vector<64x16xf32>
    %cst_19 = arith.constant dense<0.000000e+00> : vector<64xf32>
    %39 = vector.multi_reduction <add>, %38, %cst_19 [1] : vector<64x16xf32> to vector<64xf32>
    %40 = vector.shape_cast %39 : vector<64xf32> to vector<64x1xf32>
    %41 = tpu.reciprocal %40 {approx = true} : vector<64x1xf32> -> vector<64x1xf32>
    %42 = vector.broadcast %41 : vector<64x1xf32> to vector<64x16xf32>
    %43 = arith.mulf %38, %42 : vector<64x16xf32>
    %cst_20 = arith.constant dense<0.000000e+00> : vector<64x16xf32>
    %44 = tpu.matmul %43, %30, %cst_20 {dimension_numbers = #tpu.dot_dimension_numbers<[1], [0], [0], [1], [0, 0, 1, 1], [], []>} : vector<64x16xf32>, vector<16x16xf32>, vector<64x16xf32> -> vector<64x16xf32>
    %c0_21 = arith.constant 0 : index
    %c0_22 = arith.constant 0 : index
    %45 = vector.load %arg6[%c0_21, %c0_22] : memref<32x32xf32, #tpu.memory_space<vmem>>, vector<16x32xf32>
    %cst_23 = arith.constant dense<0.000000e+00> : vector<64x32xf32>
    %46 = tpu.matmul %44, %45, %cst_23 {dimension_numbers = #tpu.dot_dimension_numbers<[1], [0], [0], [1], [0, 0, 1, 1], [], []>} : vector<64x16xf32>, vector<16x32xf32>, vector<64x32xf32> -> vector<64x32xf32>
    %47 = arith.addf %27, %46 : vector<64x32xf32>
    %48 = vector.extract_strided_slice %18 {offsets = [0, 16], sizes = [64, 16], strides = [1, 1]} : vector<64x32xf32> to vector<64x16xf32>
    %49 = vector.extract_strided_slice %24 {offsets = [0, 16], sizes = [16, 16], strides = [1, 1]} : vector<16x32xf32> to vector<16x16xf32>
    %50 = vector.extract_strided_slice %25 {offsets = [0, 16], sizes = [16, 16], strides = [1, 1]} : vector<16x32xf32> to vector<16x16xf32>
    %cst_24 = arith.constant dense<0.000000e+00> : vector<64x16xf32>
    %51 = tpu.matmul %48, %49, %cst_24 {dimension_numbers = #tpu.dot_dimension_numbers<[1], [1], [0], [0], [0, 0, 1, 0], [], []>} : vector<64x16xf32>, vector<16x16xf32>, vector<64x16xf32> -> vector<64x16xf32>
    %52 = vector.extract_strided_slice %26 {offsets = [64, 0], sizes = [64, 16], strides = [1, 1]} : vector<128x16xf32> to vector<64x16xf32>
    %53 = arith.addf %51, %52 : vector<64x16xf32>
    %cst_25 = arith.constant dense<0xFF800000> : vector<64xf32>
    %54 = vector.multi_reduction <maximumf>, %53, %cst_25 [1] : vector<64x16xf32> to vector<64xf32>
    %55 = vector.shape_cast %54 : vector<64xf32> to vector<64x1xf32>
    %56 = vector.broadcast %55 : vector<64x1xf32> to vector<64x16xf32>
    %57 = arith.subf %53, %56 : vector<64x16xf32>
    %58 = math.exp %57 : vector<64x16xf32>
    %cst_26 = arith.constant dense<0.000000e+00> : vector<64xf32>
    %59 = vector.multi_reduction <add>, %58, %cst_26 [1] : vector<64x16xf32> to vector<64xf32>
    %60 = vector.shape_cast %59 : vector<64xf32> to vector<64x1xf32>
    %61 = tpu.reciprocal %60 {approx = true} : vector<64x1xf32> -> vector<64x1xf32>
    %62 = vector.broadcast %61 : vector<64x1xf32> to vector<64x16xf32>
    %63 = arith.mulf %58, %62 : vector<64x16xf32>
    %cst_27 = arith.constant dense<0.000000e+00> : vector<64x16xf32>
    %64 = tpu.matmul %63, %50, %cst_27 {dimension_numbers = #tpu.dot_dimension_numbers<[1], [0], [0], [1], [0, 0, 1, 1], [], []>} : vector<64x16xf32>, vector<16x16xf32>, vector<64x16xf32> -> vector<64x16xf32>
    %c16 = arith.constant 16 : index
    %c0_28 = arith.constant 0 : index
    %65 = vector.load %arg6[%c16, %c0_28] : memref<32x32xf32, #tpu.memory_space<vmem>>, vector<16x32xf32>
    %cst_29 = arith.constant dense<0.000000e+00> : vector<64x32xf32>
    %66 = tpu.matmul %64, %65, %cst_29 {dimension_numbers = #tpu.dot_dimension_numbers<[1], [0], [0], [1], [0, 0, 1, 1], [], []>} : vector<64x16xf32>, vector<16x32xf32>, vector<64x32xf32> -> vector<64x32xf32>
    %67 = arith.addf %47, %66 : vector<64x32xf32>
    %68 = vector.extract_strided_slice %0 {offsets = [3, 0], sizes = [1, 32], strides = [1, 1]} : vector<13x128xf32> to vector<1x32xf32>
    %69 = vector.broadcast %68 : vector<1x32xf32> to vector<64x32xf32>
    %70 = arith.addf %67, %69 : vector<64x32xf32>
    %71 = arith.addf %11, %70 : vector<64x32xf32>
    %72 = vector.extract_strided_slice %0 {offsets = [4, 0], sizes = [1, 32], strides = [1, 1]} : vector<13x128xf32> to vector<1x32xf32>
    %73 = vector.extract_strided_slice %0 {offsets = [5, 0], sizes = [1, 32], strides = [1, 1]} : vector<13x128xf32> to vector<1x32xf32>
    %cst_30 = arith.constant dense<0.000000e+00> : vector<64xf32>
    %74 = vector.multi_reduction <add>, %71, %cst_30 [1] : vector<64x32xf32> to vector<64xf32>
    %75 = vector.shape_cast %74 : vector<64xf32> to vector<64x1xf32>
    %cst_31 = arith.constant 3.200000e+01 : f32
    %76 = vector.broadcast %cst_31 : f32 to vector<64x1xf32>
    %77 = arith.divf %75, %76 : vector<64x1xf32>
    %78 = vector.broadcast %77 : vector<64x1xf32> to vector<64x32xf32>
    %79 = arith.subf %71, %78 : vector<64x32xf32>
    %80 = arith.mulf %79, %79 : vector<64x32xf32>
    %cst_32 = arith.constant dense<0.000000e+00> : vector<64xf32>
    %81 = vector.multi_reduction <add>, %80, %cst_32 [1] : vector<64x32xf32> to vector<64xf32>
    %82 = vector.shape_cast %81 : vector<64xf32> to vector<64x1xf32>
    %cst_33 = arith.constant 3.200000e+01 : f32
    %83 = vector.broadcast %cst_33 : f32 to vector<64x1xf32>
    %84 = arith.divf %82, %83 : vector<64x1xf32>
    %85 = vector.broadcast %77 : vector<64x1xf32> to vector<64x32xf32>
    %86 = arith.subf %71, %85 : vector<64x32xf32>
    %cst_34 = arith.constant 9.99999974E-6 : f32
    %87 = vector.broadcast %cst_34 : f32 to vector<64x1xf32>
    %88 = arith.addf %84, %87 : vector<64x1xf32>
    %89 = math.rsqrt %88 : vector<64x1xf32>
    %90 = vector.broadcast %89 : vector<64x1xf32> to vector<64x32xf32>
    %91 = arith.mulf %86, %90 : vector<64x32xf32>
    %92 = vector.broadcast %72 : vector<1x32xf32> to vector<64x32xf32>
    %93 = arith.mulf %91, %92 : vector<64x32xf32>
    %94 = vector.broadcast %73 : vector<1x32xf32> to vector<64x32xf32>
    %95 = arith.addf %93, %94 : vector<64x32xf32>
    %c0_35 = arith.constant 0 : index
    %c0_36 = arith.constant 0 : index
    %96 = vector.load %arg7[%c0_35, %c0_36] : memref<32x64xf32, #tpu.memory_space<vmem>>, vector<32x64xf32>
    %cst_37 = arith.constant dense<0.000000e+00> : vector<64x64xf32>
    %97 = tpu.matmul %95, %96, %cst_37 {dimension_numbers = #tpu.dot_dimension_numbers<[1], [0], [0], [1], [0, 0, 1, 1], [], []>} : vector<64x32xf32>, vector<32x64xf32>, vector<64x64xf32> -> vector<64x64xf32>
    %98 = vector.extract_strided_slice %0 {offsets = [6, 0], sizes = [1, 64], strides = [1, 1]} : vector<13x128xf32> to vector<1x64xf32>
    %99 = vector.broadcast %98 : vector<1x64xf32> to vector<64x64xf32>
    %100 = arith.addf %97, %99 : vector<64x64xf32>
    %cst_38 = arith.constant 0.000000e+00 : f32
    %101 = vector.broadcast %cst_38 : f32 to vector<64x64xf32>
    %102 = arith.maximumf %100, %101 : vector<64x64xf32>
    %c0_39 = arith.constant 0 : index
    %c0_40 = arith.constant 0 : index
    %103 = vector.load %arg8[%c0_39, %c0_40] : memref<64x32xf32, #tpu.memory_space<vmem>>, vector<64x32xf32>
    %cst_41 = arith.constant dense<0.000000e+00> : vector<64x32xf32>
    %104 = tpu.matmul %102, %103, %cst_41 {dimension_numbers = #tpu.dot_dimension_numbers<[1], [0], [0], [1], [0, 0, 1, 1], [], []>} : vector<64x64xf32>, vector<64x32xf32>, vector<64x32xf32> -> vector<64x32xf32>
    %105 = vector.extract_strided_slice %0 {offsets = [7, 0], sizes = [1, 32], strides = [1, 1]} : vector<13x128xf32> to vector<1x32xf32>
    %106 = vector.broadcast %105 : vector<1x32xf32> to vector<64x32xf32>
    %107 = arith.addf %104, %106 : vector<64x32xf32>
    %108 = arith.addf %95, %107 : vector<64x32xf32>
    %109 = vector.extract_strided_slice %0 {offsets = [8, 0], sizes = [1, 32], strides = [1, 1]} : vector<13x128xf32> to vector<1x32xf32>
    %110 = vector.extract_strided_slice %0 {offsets = [9, 0], sizes = [1, 32], strides = [1, 1]} : vector<13x128xf32> to vector<1x32xf32>
    %cst_42 = arith.constant dense<0.000000e+00> : vector<64xf32>
    %111 = vector.multi_reduction <add>, %108, %cst_42 [1] : vector<64x32xf32> to vector<64xf32>
    %112 = vector.shape_cast %111 : vector<64xf32> to vector<64x1xf32>
    %cst_43 = arith.constant 3.200000e+01 : f32
    %113 = vector.broadcast %cst_43 : f32 to vector<64x1xf32>
    %114 = arith.divf %112, %113 : vector<64x1xf32>
    %115 = vector.broadcast %114 : vector<64x1xf32> to vector<64x32xf32>
    %116 = arith.subf %108, %115 : vector<64x32xf32>
    %117 = arith.mulf %116, %116 : vector<64x32xf32>
    %cst_44 = arith.constant dense<0.000000e+00> : vector<64xf32>
    %118 = vector.multi_reduction <add>, %117, %cst_44 [1] : vector<64x32xf32> to vector<64xf32>
    %119 = vector.shape_cast %118 : vector<64xf32> to vector<64x1xf32>
    %cst_45 = arith.constant 3.200000e+01 : f32
    %120 = vector.broadcast %cst_45 : f32 to vector<64x1xf32>
    %121 = arith.divf %119, %120 : vector<64x1xf32>
    %122 = vector.broadcast %114 : vector<64x1xf32> to vector<64x32xf32>
    %123 = arith.subf %108, %122 : vector<64x32xf32>
    %cst_46 = arith.constant 9.99999974E-6 : f32
    %124 = vector.broadcast %cst_46 : f32 to vector<64x1xf32>
    %125 = arith.addf %121, %124 : vector<64x1xf32>
    %126 = math.rsqrt %125 : vector<64x1xf32>
    %127 = vector.broadcast %126 : vector<64x1xf32> to vector<64x32xf32>
    %128 = arith.mulf %123, %127 : vector<64x32xf32>
    %129 = vector.broadcast %109 : vector<1x32xf32> to vector<64x32xf32>
    %130 = arith.mulf %128, %129 : vector<64x32xf32>
    %131 = vector.broadcast %110 : vector<1x32xf32> to vector<64x32xf32>
    %132 = arith.addf %130, %131 : vector<64x32xf32>
    %c0_47 = arith.constant 0 : index
    %c0_48 = arith.constant 0 : index
    %133 = vector.load %arg9[%c0_47, %c0_48] : memref<32x64xf32, #tpu.memory_space<vmem>>, vector<32x64xf32>
    %cst_49 = arith.constant dense<0.000000e+00> : vector<64x64xf32>
    %134 = tpu.matmul %132, %133, %cst_49 {dimension_numbers = #tpu.dot_dimension_numbers<[1], [0], [0], [1], [0, 0, 1, 1], [], []>} : vector<64x32xf32>, vector<32x64xf32>, vector<64x64xf32> -> vector<64x64xf32>
    %135 = vector.extract_strided_slice %0 {offsets = [10, 0], sizes = [1, 64], strides = [1, 1]} : vector<13x128xf32> to vector<1x64xf32>
    %136 = vector.broadcast %135 : vector<1x64xf32> to vector<64x64xf32>
    %137 = arith.addf %134, %136 : vector<64x64xf32>
    %cst_50 = arith.constant 0.000000e+00 : f32
    %138 = vector.broadcast %cst_50 : f32 to vector<64x64xf32>
    %139 = arith.maximumf %137, %138 : vector<64x64xf32>
    %c0_51 = arith.constant 0 : index
    %c0_52 = arith.constant 0 : index
    %140 = vector.load %arg10[%c0_51, %c0_52] : memref<64x64xf32, #tpu.memory_space<vmem>>, vector<64x64xf32>
    %cst_53 = arith.constant dense<0.000000e+00> : vector<64x64xf32>
    %141 = tpu.matmul %139, %140, %cst_53 {dimension_numbers = #tpu.dot_dimension_numbers<[1], [0], [0], [1], [0, 0, 1, 1], [], []>} : vector<64x64xf32>, vector<64x64xf32>, vector<64x64xf32> -> vector<64x64xf32>
    %142 = vector.extract_strided_slice %0 {offsets = [11, 0], sizes = [1, 64], strides = [1, 1]} : vector<13x128xf32> to vector<1x64xf32>
    %143 = vector.broadcast %142 : vector<1x64xf32> to vector<64x64xf32>
    %144 = arith.addf %141, %143 : vector<64x64xf32>
    %cst_54 = arith.constant 0.000000e+00 : f32
    %145 = vector.broadcast %cst_54 : f32 to vector<64x64xf32>
    %146 = arith.maximumf %144, %145 : vector<64x64xf32>
    %c0_55 = arith.constant 0 : index
    %c0_56 = arith.constant 0 : index
    %147 = vector.load %arg11[%c0_55, %c0_56] : memref<64x6xf32, #tpu.memory_space<vmem>>, vector<64x6xf32>
    %cst_57 = arith.constant dense<0.000000e+00> : vector<64x6xf32>
    %148 = tpu.matmul %146, %147, %cst_57 {dimension_numbers = #tpu.dot_dimension_numbers<[1], [0], [0], [1], [0, 0, 1, 1], [], []>} : vector<64x64xf32>, vector<64x6xf32>, vector<64x6xf32> -> vector<64x6xf32>
    %149 = vector.extract_strided_slice %0 {offsets = [12, 0], sizes = [1, 6], strides = [1, 1]} : vector<13x128xf32> to vector<1x6xf32>
    %150 = vector.broadcast %149 : vector<1x6xf32> to vector<64x6xf32>
    %151 = arith.addf %148, %150 : vector<64x6xf32>
    %152 = tpu.iota {dimensions = array<i32: 1>} : vector<64x6xi32>
    %c2_i32 = arith.constant 2 : i32
    %153 = vector.broadcast %c2_i32 : i32 to vector<64x6xi32>
    %154 = arith.cmpi slt, %152, %153 : vector<64x6xi32>
    %155 = arith.negf %151 : vector<64x6xf32>
    %156 = math.exp %155 : vector<64x6xf32>
    %cst_58 = arith.constant 1.000000e+00 : f32
    %157 = vector.broadcast %cst_58 : f32 to vector<64x6xf32>
    %158 = arith.addf %157, %156 : vector<64x6xf32>
    %159 = arith.divf %157, %158 : vector<64x6xf32>
    %160 = arith.select %154, %151, %159 : vector<64x6xi1>, vector<64x6xf32>
    %c0_59 = arith.constant 0 : index
    %c0_60 = arith.constant 0 : index
    %c0_61 = arith.constant 0 : index
    %161 = vector.load %arg13[%c0_59, %c0_60, %c0_61] : memref<1x64x6xf32, #tpu.memory_space<vmem>>, vector<1x64x6xf32>
    %162 = vector.shape_cast %161 : vector<1x64x6xf32> to vector<64x6xf32>
    %163 = vector.shape_cast %160 : vector<64x6xf32> to vector<1x64x6xf32>
    tpu.vector_store %arg13[%c0_59, %c0_60, %c0_61], %163 {strides = array<i32>} : memref<1x64x6xf32, #tpu.memory_space<vmem>>, vector<1x64x6xf32>,
    return
  }
  func.func @transform_0(%arg0: i32) -> (i32, i32, i32) {
    %c0_i32 = arith.constant 0 : i32
    %c0_i32_0 = arith.constant 0 : i32
    %c0_i32_1 = arith.constant 0 : i32
    return %arg0, %c0_i32, %c0_i32_0 : i32, i32, i32
  }
  func.func @transform_1(%arg0: i32) -> (i32, i32) {
    %c0_i32 = arith.constant 0 : i32
    %c0_i32_0 = arith.constant 0 : i32
    %c0_i32_1 = arith.constant 0 : i32
    return %c0_i32, %c0_i32_0 : i32, i32
  }
  func.func @transform_2(%arg0: i32) -> (i32, i32) {
    %c0_i32 = arith.constant 0 : i32
    %c0_i32_0 = arith.constant 0 : i32
    %c0_i32_1 = arith.constant 0 : i32
    return %c0_i32, %c0_i32_0 : i32, i32
  }
  func.func @transform_3(%arg0: i32) -> (i32, i32) {
    %c0_i32 = arith.constant 0 : i32
    %c0_i32_0 = arith.constant 0 : i32
    %c0_i32_1 = arith.constant 0 : i32
    return %c0_i32, %c0_i32_0 : i32, i32
  }
  func.func @transform_4(%arg0: i32) -> (i32, i32) {
    %c0_i32 = arith.constant 0 : i32
    %c0_i32_0 = arith.constant 0 : i32
    %c0_i32_1 = arith.constant 0 : i32
    return %c0_i32, %c0_i32_0 : i32, i32
  }
  func.func @transform_5(%arg0: i32) -> (i32, i32) {
    %c0_i32 = arith.constant 0 : i32
    %c0_i32_0 = arith.constant 0 : i32
    %c0_i32_1 = arith.constant 0 : i32
    return %c0_i32, %c0_i32_0 : i32, i32
  }
  func.func @transform_6(%arg0: i32) -> (i32, i32) {
    %c0_i32 = arith.constant 0 : i32
    %c0_i32_0 = arith.constant 0 : i32
    %c0_i32_1 = arith.constant 0 : i32
    return %c0_i32, %c0_i32_0 : i32, i32
  }
  func.func @transform_7(%arg0: i32) -> (i32, i32) {
    %c0_i32 = arith.constant 0 : i32
    %c0_i32_0 = arith.constant 0 : i32
    %c0_i32_1 = arith.constant 0 : i32
    return %c0_i32, %c0_i32_0 : i32, i32
  }
  func.func @transform_8(%arg0: i32) -> (i32, i32) {
    %c0_i32 = arith.constant 0 : i32
    %c0_i32_0 = arith.constant 0 : i32
    %c0_i32_1 = arith.constant 0 : i32
    return %c0_i32, %c0_i32_0 : i32, i32
  }
  func.func @transform_9(%arg0: i32) -> (i32, i32) {
    %c0_i32 = arith.constant 0 : i32
    %c0_i32_0 = arith.constant 0 : i32
    %c0_i32_1 = arith.constant 0 : i32
    return %c0_i32, %c0_i32_0 : i32, i32
  }
  func.func @transform_10(%arg0: i32) -> (i32, i32) {
    %c0_i32 = arith.constant 0 : i32
    %c0_i32_0 = arith.constant 0 : i32
    %c0_i32_1 = arith.constant 0 : i32
    return %c0_i32, %c0_i32_0 : i32, i32
  }
  func.func @transform_11(%arg0: i32) -> (i32, i32) {
    %c0_i32 = arith.constant 0 : i32
    %c0_i32_0 = arith.constant 0 : i32
    %c0_i32_1 = arith.constant 0 : i32
    return %c0_i32, %c0_i32_0 : i32, i32
  }
  func.func @transform_12(%arg0: i32) -> (i32, i32, i32) {
    %c0_i32 = arith.constant 0 : i32
    %c0_i32_0 = arith.constant 0 : i32
    %c0_i32_1 = arith.constant 0 : i32
    return %arg0, %c0_i32, %c0_i32_0 : i32, i32, i32
  }
}

</mosaic_0001>

<bundles_post_ra>
// kernel: relative_position_transt_forward.1
= control target key start
LH: loop header
LB: loop body
LE: loop exit
PB: predicated region body
PF: predicated region fallthrough
CT: control target
= control target key end

     0   :  { %s2667_s21 = smov 0   ;;  %s3542_s0 = inlined_call_operand.vmem [shape: f32[2,80,36], index: 0, kind: input, shape index: {}]   ;;  %s3543_s1 = inlined_call_operand.vmem [shape: f32[36,32], index: 1, kind: input, shape index: {}]   ;;  %s3544_s2 = inlined_call_operand.vmem [shape: f32[32,32], index: 2, kind: input, shape index: {}]   ;;  %s3545_s3 = inlined_call_operand.vmem [shape: f32[32,64], index: 3, kind: input, shape index: {}]   ;;  %s3546_s4 = inlined_call_operand.vmem [shape: f32[128,16], index: 4, kind: input, shape index: {}]   ;;  %s3547_s5 = inlined_call_operand.vmem [shape: f32[32,32], index: 5, kind: input, shape index: {}]   ;;  %s3548_s6 = inlined_call_operand.vmem [shape: f32[32,64], index: 6, kind: input, shape index: {}]   ;;  %s3549_s7 = inlined_call_operand.vmem [shape: f32[64,32], index: 7, kind: input, shape index: {}]   ;;  %s3550_s8 = inlined_call_operand.vmem [shape: f32[32,64], index: 8, kind: input, shape index: {}]   ;;  %s3551_s9 = inlined_call_operand.vmem [shape: f32[64,64], index: 9, kind: input, shape index: {}]   ;;  %s3552_s10 = inlined_call_operand.vmem [shape: f32[64,6], index: 10, kind: input, shape index: {}]   ;;  %s3553_s11 = inlined_call_operand.vmem [shape: f32[13,128], index: 11, kind: input, shape index: {}]   ;;  %s3554_s12 = inlined_call_operand.vmem [shape: f32[2,64,6], index: 12, kind: output, shape index: {}]  }
   0x1 LB: > { %s2292_s22 = sadd.s32 4294967295, %s2596_s21   ;;  %p2296_p0 = scmp.ge.s32.totalorder %s2596_s21, 1  ;;  %s2596_s21 = sphi %s2667_s21, %s22_s21  }
   0x2   : > { %p362_p1 = scmp.lt.s32.totalorder %s2596_s21, 3 }
   0x4   : > { %p363_p2 = pnand %p2296_p0, %p362_p1 }
   0x5   : > { %p404_p3 = scmp.lt.s32.totalorder (!%p363_p2), %s2292_s22, 1  ;;  %s2598_s23 = smov (!%p363_p2), 112  }
   0x6   : > { %366 = sbr.rel (%p363_p2) target bundleno = 2501 (0x9c5), region = 68  ;;  %s2599_s24 = smov (!%p363_p2), 80  }
   0x7   : > { %s2600_s25 = smov (!%p363_p2), 96  }
   0xb   : > { %v430_v0 = vld [vmem:[%s3543_s1 + $0x20] sm:$0xf]  ;;  %vm463_vm0 = vcmask 1043456   ;;  %v429_v1 = vld [vmem:[%s3543_s1 + $0x18] sm:$0xff]  ;;  %v428_v2 = vld [vmem:[%s3543_s1 + $0x10] sm:$0xff]  ;;  %s3556_s22 = smov (!%p404_p3, %s2292_s22), 1 }
   0xc   : > { %2300 = vmatpush.msk.msra.mxu0 %vm463_vm0, %v430_v0  ;;  %v427_v3 = vld [vmem:[%s3543_s1 + $0x8] sm:$0xff]  ;;  %s2436_s13 = smul.u32 80, %s3556_s22  ;;  %v426_v4 = vld [vmem:[%s3543_s1] sm:$0xff]  ;;  %vm432_vm1 = vcmask 293888   ;;  %v527_v15 = vld [vmem:[%s3544_s2 + $0x18] sm:$0xff]  ;;  %vm529_vm2 = vcmask 261120  }
   0xd   : > { %2424 = vmatpush.msra.mxu1 %v527_v15  ;;  %2425 = vmatpush.msra.mxu2 %v527_v15  ;;  %v526_v16 = vld [vmem:[%s3544_s2 + $0x10] sm:$0xff]  ;;  %v525_v17 = vld [vmem:[%s3544_s2 + $0x8] sm:$0xff]  ;;  %v524_v18 = vld [vmem:[%s3544_s2] sm:$0xff]  ;;  %vm653_vm3 = vcmask 130048   ;;  %s2423_s20 = sshll.u32 %s3556_s22, 6 }
   0xe   : > { %479 = vmatpush.msra.mxu0 %v429_v1  ;;  %s408_s18 = scalar_lea.vmem %s3542_s0, %s2436_s13  ;;  %2426 = vmatpush.msra.mxu3 %v527_v15  ;;  %v2721_v21 = vld [vmem:[%s3553_s11] sm:$0xff]  ;;  %v606_v26 = vld [vmem:[%s3545_s3 + $0x18] sm:$0xff]  ;;  %v605_v27 = vld [vmem:[%s3545_s3 + $0x10] sm:$0xff] }
   0xf   : > { %v416_v5 = vld [vmem:[%s408_s18] sm:$0xff]  ;;  %v417_v6 = vld [vmem:[%s408_s18 + $0x8] sm:$0xff]  ;;  %v418_v7 = vld [vmem:[%s408_s18 + $0x10] sm:$0xff]  ;;  %2427 = vmatpush.msra.mxu1 %v526_v16  ;;  %2428 = vmatpush.msra.mxu2 %v526_v16  ;;  %v431_v22 = vperm.slane %v2721_v21, 0  ;;  %v528_v55 = vperm.slane %v2721_v21, 1 }
  0x10   : > { %480 = vmatpush.msra.mxu0 %v428_v2  ;;  %v419_v8 = vld [vmem:[%s408_s18 + $0x18] sm:$0xff]  ;;  %v420_v9 = vld [vmem:[%s408_s18 + $0x20] sm:$0xff]  ;;  %v421_v10 = vld [vmem:[%s408_s18 + $0x28] sm:$0xff]  ;;  %2429 = vmatpush.msra.mxu3 %v526_v16 }
  0x11   : > { %v422_v11 = vld [vmem:[%s408_s18 + $0x30] sm:$0xff]  ;;  %v423_v12 = vld [vmem:[%s408_s18 + $0x38] sm:$0xff]  ;;  %v424_v13 = vld [vmem:[%s408_s18 + $0x40] sm:$0xff]  ;;  %2430 = vmatpush.msra.mxu1 %v525_v17  ;;  %2431 = vmatpush.msra.mxu2 %v525_v17 }
  0x12   : > { %481 = vmatpush.msra.mxu0 %v427_v3  ;;  %v425_v14 = vld [vmem:[%s408_s18 + $0x48] sm:$0xff]  ;;  %2432 = vmatpush.msra.mxu3 %v525_v17  ;;  %v603_v31 = vld [vmem:[%s3545_s3] sm:$0xff] }
  0x13   : > { %2433 = vmatpush.msra.mxu1 %v524_v18  ;;  %2434 = vmatpush.msra.mxu2 %v524_v18  ;;  %v604_v28 = vld [vmem:[%s3545_s3 + $0x8] sm:$0xff] }
  0x14   : > { %482 = vmatpush.msra.mxu0 %v426_v4  ;;  %2435 = vmatpush.msra.mxu3 %v524_v18 }
  0x15   : > { %2301 = vmatmul.msk.f32.vlgmr.msra.gmra.mxu0 %vm432_vm1, %v416_v5  ;;  %626 = vmatpush.msrb.mxu2 %v606_v26 }
  0x16   : > { %566 = vmatpush.msrb.mxu0 %v527_v15 }
  0x17   : > { %627 = vmatpush.msrb.mxu2 %v605_v27 }
  0x18   : > { %567 = vmatpush.msrb.mxu0 %v526_v16 }
  0x19   : > { %628 = vmatpush.msrb.mxu2 %v604_v28 }
  0x1a   : > { %568 = vmatpush.msrb.mxu0 %v525_v17 }
  0x1b   : > { %629 = vmatpush.msrb.mxu2 %v603_v31 }
  0x1c   : > { %569 = vmatpush.msrb.mxu0 %v524_v18 }
  0x1d   : > { %2302 = vmatmul.msk.f32.gmra.mxu0 %vm432_vm1, %v417_v6  ;;  %v607_v6 = vperm.slane %v2721_v21, 2 }
  0x25   : > { %2303 = vmatmul.msk.f32.gmra.mxu0 %vm432_vm1, %v418_v7 }
  0x2d   : > { %2304 = vmatmul.msk.f32.gmra.mxu0 %vm432_vm1, %v419_v8 }
  0x35   : > { %2305 = vmatmul.msk.f32.gmra.mxu0 %vm432_vm1, %v420_v9 }
  0x3d   : > { %2306 = vmatmul.msk.f32.gmra.mxu0 %vm432_vm1, %v421_v10 }
  0x45   : > { %2307 = vmatmul.msk.f32.gmra.mxu0 %vm432_vm1, %v422_v11 }
  0x4d   : > { %2308 = vmatmul.msk.f32.gmra.mxu0 %vm432_vm1, %v423_v12 }
  0x55   : > { %2309 = vmatmul.msk.f32.gmra.mxu0 %vm432_vm1, %v424_v13 }
  0x5d   : > { %2310 = vmatmul.msk.f32.gmra.mxu0 %vm432_vm1, %v425_v14 }
  0x92   : > { %v484_v19 = vpop.f32.mrf.mxu0 }
  0x93   : > { %v485_v42 = vadd.f32 %v484_v19, %v431_v22 }
  0x95   : > { %v514_v45 = vmax.f32 %v485_v42, 0.0  ;;  %v638_v42 = vld [vmem:[%s3546_s4 + $0x8] sm:$0xff] }
  0x9a   : > { %v487_v20 = vpop.f32.mrf.mxu0 }
  0x9b   : > { %v488_v47 = vadd.f32 %v487_v20, %v431_v22 }
  0x9d   : > { %v515_v50 = vmax.f32 %v488_v47, 0.0 }
  0xa2   : > { %v490_v23 = vpop.f32.mrf.mxu0 }
  0xa3   : > { %v2724_v24 = vadd.f32 %v490_v23, %v431_v22 }
  0xa5   : > { %v516_v25 = vmax.f32 %v2724_v24, 0.0 }
  0xa7   : > { %2311 = vmatmul.msk.f32.vlgmr.msrb.gmra.mxu0 %vm529_vm2, %v516_v25 }
  0xaa   : > { %v493_v29 = vpop.f32.mrf.mxu0 }
  0xab   : > { %v2739_v30 = vadd.f32 %v493_v29, %v431_v22  ;;  %v637_v29 = vld [vmem:[%s3546_s4] sm:$0xff] }
  0xad   : > { %v517_v32 = vmax.f32 %v2739_v30, 0.0 }
  0xaf   : > { %2312 = vmatmul.msk.f32.vlgmr.msra.gmra.mxu1 %vm529_vm2, %v517_v32 }
  0xb2   : > { %v496_v33 = vpop.f32.mrf.mxu0 }
  0xb3   : > { %v2748_v34 = vadd.f32 %v496_v33, %v431_v22 }
  0xb5   : > { %v518_v35 = vmax.f32 %v2748_v34, 0.0 }
  0xb7   : > { %2313 = vmatmul.msk.f32.gmra.mxu1 %vm529_vm2, %v518_v35 }
  0xba   : > { %v499_v36 = vpop.f32.mrf.mxu0 }
  0xbb   : > { %v2754_v37 = vadd.f32 %v499_v36, %v431_v22 }
  0xbd   : > { %v519_v38 = vmax.f32 %v2754_v37, 0.0 }
  0xbf   : > { %2314 = vmatmul.msk.f32.gmra.mxu1 %vm529_vm2, %v519_v38 }
  0xc2   : > { %v502_v39 = vpop.f32.mrf.mxu0 }
  0xc3   : > { %v2760_v40 = vadd.f32 %v502_v39, %v431_v22 }
  0xc5   : > { %v520_v41 = vmax.f32 %v2760_v40, 0.0 }
  0xc7   : > { %2315 = vmatmul.msk.f32.vlgmr.msra.gmra.mxu2 %vm529_vm2, %v520_v41 }
  0xca   : > { %v505_v43 = vpop.f32.mrf.mxu0 }
  0xcb   : > { %v2766_v44 = vadd.f32 %v505_v43, %v431_v22 }
  0xcd   : > { %v521_v46 = vmax.f32 %v2766_v44, 0.0 }
  0xcf   : > { %2319 = vmatmul.msk.f32.vlgmr.msrb.gmra.mxu2 %vm529_vm2, %v514_v45  ;;  %2316 = vmatmul.msk.f32.vlgmr.msra.gmra.mxu3 %vm529_vm2, %v521_v46 }
  0xd2   : > { %v508_v48 = vpop.f32.mrf.mxu0 }
  0xd3   : > { %v2773_v49 = vadd.f32 %v508_v48, %v431_v22 }
  0xd5   : > { %v522_v51 = vmax.f32 %v2773_v49, 0.0 }
  0xd7   : > { %2320 = vmatmul.msk.f32.gmra.mxu2 %vm529_vm2, %v515_v50  ;;  %2317 = vmatmul.msk.f32.gmra.mxu3 %vm529_vm2, %v522_v51  ;;  %v639_v50 = vld [vmem:[%s3546_s4 + $0x10] sm:$0xff] }
  0xda   : > { %v511_v52 = vpop.f32.mrf.mxu0 }
  0xdb   : > { %v2780_v53 = vadd.f32 %v511_v52, %v431_v22 }
  0xdd   : > { %v523_v54 = vmax.f32 %v2780_v53, 0.0 }
  0xdf   : > { %2318 = vmatmul.msk.f32.gmra.mxu3 %vm529_vm2, %v523_v54 }
 0x124   : > { %v571_v56 = vpop.f32.mrf.mxu0 }
 0x125   : > { %v572_v57 = vadd.f32 %v571_v56, %v528_v55 }
 0x127   : > { %v595_v58 = vmul.f32 0.25, %v572_v57 }
 0x129   : > { %886 = vrot.lane.b32.xlu1 %v595_v58, %s2598_s23 }
 0x12c   : > { %v574_v59 = vpop.f32.mrf.mxu1 }
 0x12d   : > { %v575_v60 = vadd.f32 %v574_v59, %v528_v55 }
 0x12f   : > { %v596_v61 = vmul.f32 0.25, %v575_v60 }
 0x131   : > { %888 = vrot.lane.b32.xlu1 %v596_v61, %s2598_s23 }
 0x134   : > { %v577_v62 = vpop.f32.mrf.mxu1 }
 0x135   : > { %v578_v63 = vadd.f32 %v577_v62, %v528_v55 }
 0x137   : > { %v597_v0 = vmul.f32 0.25, %v578_v63  ;;  %v641_v63 = vld [vmem:[%s3546_s4 + $0x20] sm:$0xff] }
 0x139   : > { %890 = vrot.lane.b32.xlu2 %v597_v0, %s2598_s23 }
 0x13c   : > { %v580_v1 = vpop.f32.mrf.mxu1 }
 0x13d   : > { %v581_v2 = vadd.f32 %v580_v1, %v528_v55 }
 0x13f   : > { %v598_v3 = vmul.f32 0.25, %v581_v2 }
 0x141   : > { %892 = vrot.lane.b32.xlu2 %v598_v3, %s2598_s23 }
 0x14a   : > { %v583_v4 = vpop.f32.mrf.mxu2 }
 0x14b   : > { %v584_v13 = vadd.f32 %v583_v4, %v528_v55  ;;  %v642_v4 = vld [vmem:[%s3546_s4 + $0x28] sm:$0xff] }
 0x14d   : > { %v599_v15 = vmul.f32 0.25, %v584_v13 }
 0x152   : > { %v631_v5 = vpop.f32.mrf.mxu2  ;;  %v586_v11 = vpop.f32.mrf.mxu3 }
 0x153   : > { %v632_v8 = vadd.f32 %v631_v5, %v607_v6  ;;  %v587_v12 = vadd.f32 %v586_v11, %v528_v55 }
 0x155   : > { %v600_v14 = vmul.f32 0.25, %v587_v12 }
 0x157   : > { %896 = vrot.lane.b32.xlu1 %v600_v14, %s2598_s23 }
 0x15a   : > { %v634_v7 = vpop.f32.mrf.mxu2  ;;  %v589_v16 = vpop.f32.mrf.mxu3 }
 0x15b   : > { %v635_v9 = vadd.f32 %v634_v7, %v607_v6  ;;  %v590_v17 = vadd.f32 %v589_v16, %v528_v55 }
 0x15d   : > { %904 = vrot.lane.b32.xlu0 %v635_v9, %s2598_s23  ;;  %2321 = vmatpush.xpose.msk.msrb.mxu3 %vm653_vm3, %v635_v9  ;;  %v2794_v10 = vpack.i.bf16 %v632_v8, %v635_v9  ;;  %v601_v18 = vmul.f32 0.25, %v590_v17  ;;  %v643_v9 = vld [vmem:[%s3546_s4 + $0x30] sm:$0xff] }
 0x15f   : > { %898 = vrot.lane.b32.xlu2 %v601_v18, %s2598_s23 }
 0x161   : > { %2322 = vmatpush.xpose.msk.msrb.mxu3 %vm653_vm3, %v632_v8 }
 0x162   : > { %v592_v19 = vpop.f32.mrf.mxu3 }
 0x163   : > { %v593_v20 = vadd.f32 %v592_v19, %v528_v55 }
 0x164   : > { %2323 = vmatmul.msk.f32.vlgmr.msrb.gmra.mxu3 %vm653_vm3, %v595_v58  ;;  %v640_v58 = vld [vmem:[%s3546_s4 + $0x18] sm:$0xff] }
 0x165   : > { %902 = vrot.lane.b32.xlu0 %v632_v8, %s2598_s23  ;;  %v602_v22 = vmul.f32 0.25, %v593_v20 }
 0x16c   : > { %2324 = vmatmul.msk.f32.gmra.mxu3 %vm653_vm3, %v596_v61 }
 0x16d   : > { %894 = vrot.lane.b32.xlu0 %v599_v15, %s2598_s23 }
 0x174   : > { %2325 = vmatmul.msk.f32.gmra.mxu3 %vm653_vm3, %v597_v0 }
 0x175   : > { %900 = vrot.lane.b32.xlu0 %v602_v22, %s2598_s23 }
 0x17c   : > { %2326 = vmatmul.msk.f32.gmra.mxu3 %vm653_vm3, %v598_v3 }
 0x184   : > { %2327 = vmatmul.msk.f32.gmra.mxu3 %vm653_vm3, %v599_v15 }
 0x18c   : > { %2328 = vmatmul.msk.f32.gmra.mxu3 %vm653_vm3, %v600_v14  ;;  %v645_v14 = vld [vmem:[%s3546_s4 + $0x40] sm:$0xff] }
 0x193   : > { %v891_v33 = vpop.permute.xlu2 %890 }
 0x194   : > { %2329 = vmatmul.msk.f32.gmra.mxu3 %vm653_vm3, %v601_v18  ;;  %v646_v18 = vld [vmem:[%s3546_s4 + $0x48] sm:$0xff] }
 0x19b   : > { %v887_v27 = vpop.permute.xlu1 %886  ;;  %v893_v47 = vpop.permute.xlu2 %892 }
 0x19c   : > { %2330 = vmatmul.msk.f32.gmra.mxu3 %vm653_vm3, %v602_v22 }
 0x1a3   : > { %v889_v28 = vpop.permute.xlu1 %888 }
 0x1b9   : > { %v899_v2 = vpop.permute.xlu2 %898 }
 0x1c9   : > { %v897_v61 = vpop.permute.xlu1 %896 }
 0x1cf   : > { %v905_v23 = vpop.permute.xlu0 %904 }
 0x1d0   : > { %2339 = vmatpush.xpose.msk.msrb.mxu1 %vm653_vm3, %v905_v23 }
 0x1d7   : > { %v903_v26 = vpop.permute.xlu0 %902 }
 0x1d8   : > { %2340 = vmatpush.xpose.msk.msrb.mxu1 %vm653_vm3, %v903_v26 }
 0x1db   : > { %2341 = vmatmul.msk.f32.vlgmr.msrb.gmra.mxu1 %vm653_vm3, %v887_v27 }
 0x1df   : > { %v895_v56 = vpop.permute.xlu0 %894 }
 0x1e3   : > { %2342 = vmatmul.msk.f32.gmra.mxu1 %vm653_vm3, %v889_v28  ;;  %v647_v28 = vld [vmem:[%s3546_s4 + $0x50] sm:$0xff] }
 0x1e7   : > { %v701_v31 = vpop.f32.mrf.mxu3  ;;  %v901_v7 = vpop.permute.xlu0 %900 }
 0x1e8   : > { %v702_v36 = vadd.f32 %v701_v31, %v637_v29 }
 0x1ea   : > { %v725_v39 = vsel %vm653_vm3, %v702_v36, -inf }
 0x1eb   : > { %2343 = vmatmul.msk.f32.gmra.mxu1 %vm653_vm3, %v891_v33  ;;  %726 = vmax.xlane.f32.xlu2 %v725_v39 }
 0x1ef   : > { %v704_v43 = vpop.f32.mrf.mxu3 }
 0x1f0   : > { %v2822_v45 = vadd.f32 %v704_v43, %v638_v42 }
 0x1f2   : > { %v728_v48 = vsel %vm653_vm3, %v2822_v45, -inf }
 0x1f3   : > { %2344 = vmatmul.msk.f32.gmra.mxu1 %vm653_vm3, %v893_v47  ;;  %729 = vmax.xlane.f32.xlu2 %v728_v48 }
 0x1f7   : > { %v707_v52 = vpop.f32.mrf.mxu3 }
 0x1f8   : > { %v2830_v55 = vadd.f32 %v707_v52, %v639_v50  ;;  %v644_v50 = vld [vmem:[%s3546_s4 + $0x38] sm:$0xff] }
 0x1fa   : > { %v731_v57 = vsel %vm653_vm3, %v2830_v55, -inf }
 0x1fb   : > { %2345 = vmatmul.msk.f32.gmra.mxu1 %vm653_vm3, %v895_v56  ;;  %732 = vmax.xlane.f32.xlu2 %v731_v57  ;;  %v649_v56 = vld [vmem:[%s3546_s4 + $0x60] sm:$0xff] }
 0x1ff   : > { %v710_v59 = vpop.f32.mrf.mxu3 }
 0x200   : > { %v2838_v60 = vadd.f32 %v710_v59, %v640_v58 }
 0x202   : > { %v734_v62 = vsel %vm653_vm3, %v2838_v60, -inf }
 0x203   : > { %2346 = vmatmul.msk.f32.gmra.mxu1 %vm653_vm3, %v897_v61  ;;  %735 = vmax.xlane.f32.xlu1 %v734_v62 }
 0x207   : > { %v713_v0 = vpop.f32.mrf.mxu3 }
 0x208   : > { %v2846_v1 = vadd.f32 %v713_v0, %v641_v63  ;;  %v650_v63 = vld [vmem:[%s3546_s4 + $0x68] sm:$0xff] }
 0x20a   : > { %v737_v3 = vsel %vm653_vm3, %v2846_v1, -inf }
 0x20b   : > { %2347 = vmatmul.msk.f32.gmra.mxu1 %vm653_vm3, %v899_v2  ;;  %738 = vmax.xlane.f32.xlu0 %v737_v3 }
 0x20f   : > { %v716_v5 = vpop.f32.mrf.mxu3 }
 0x210   : > { %v2854_v6 = vadd.f32 %v716_v5, %v642_v4  ;;  %v651_v4 = vld [vmem:[%s3546_s4 + $0x70] sm:$0xff] }
 0x212   : > { %v740_v8 = vsel %vm653_vm3, %v2854_v6, -inf }
 0x213   : > { %2348 = vmatmul.msk.f32.gmra.mxu1 %vm653_vm3, %v901_v7  ;;  %741 = vmax.xlane.f32.xlu2 %v740_v8 }
 0x217   : > { %v719_v11 = vpop.f32.mrf.mxu3 }
 0x218   : > { %v2862_v12 = vadd.f32 %v719_v11, %v643_v9  ;;  %v652_v9 = vld [vmem:[%s3546_s4 + $0x78] sm:$0xff] }
 0x21a   : > { %v743_v13 = vsel %vm653_vm3, %v2862_v12, -inf }
 0x21b   : > { %744 = vmax.xlane.f32.xlu2 %v743_v13 }
 0x21f   : > { %v722_v52 = vpop.f32.mrf.mxu3 }
 0x220   : > { %v2904_v57 = vadd.f32 %v722_v52, %v644_v50 }
 0x222   : > { %v746_v62 = vsel %vm653_vm3, %v2904_v57, -inf }
 0x258   : > { %v943_v15 = vpop.f32.mrf.mxu1 }
 0x259   : > { %v2869_v16 = vadd.f32 %v943_v15, %v645_v14 }
 0x25b   : > { %v967_v17 = vsel %vm653_vm3, %v2869_v16, -inf }
 0x25c   : > { %968 = vmax.xlane.f32.xlu1 %v967_v17 }
 0x25e   : > { %v727_v19 = vpop.xlane.xlu2 %726 }
 0x25f   : > { %v749_v23 = vsub.f32 %v702_v36, %v727_v19  ;;  %v648_v36 = vld [vmem:[%s3546_s4 + $0x58] sm:$0xff] }
 0x260   : > { %v946_v20 = vpop.f32.mrf.mxu1 }
 0x261   : > { %v2876_v22 = vadd.f32 %v946_v20, %v646_v18  ;;  %v757_v27 = vmul.f32 1.442695, %v749_v23 }
 0x263   : > { %v970_v26 = vsel %vm653_vm3, %v2876_v22, -inf  ;;  %2459 = vpow2.f32 %v757_v27 }
 0x264   : > { %971 = vmax.xlane.f32.xlu0 %v970_v26 }
 0x266   : > { %v730_v15 = vpop.xlane.xlu2 %729 }
 0x268   : > { %v949_v29 = vpop.f32.mrf.mxu1 }
 0x269   : > { %v2883_v31 = vadd.f32 %v949_v29, %v647_v28  ;;  %v2890_v39 = vpop.eup %2459 }
 0x26a   : > { %v773_v48 = vsel %vm653_vm3, %v2890_v39, 0.0 }
 0x26b   : > { %v973_v33 = vsel %vm653_vm3, %v2883_v31, -inf }
 0x26c   : > { %974 = vmax.xlane.f32.xlu1 %v973_v33 }
 0x26e   : > { %v733_v17 = vpop.xlane.xlu2 %732 }
 0x26f   : > { %v751_v19 = vsub.f32 %v2830_v55, %v733_v17 }
 0x270   : > { %v952_v42 = vpop.f32.mrf.mxu1 }
 0x271   : > { %v2892_v43 = vadd.f32 %v952_v42, %v648_v36  ;;  %v761_v20 = vmul.f32 1.442695, %v751_v19 }
 0x273   : > { %v976_v47 = vsel %vm653_vm3, %v2892_v43, -inf  ;;  %2461 = vpow2.f32 %v761_v20 }
 0x274   : > { %977 = vmax.xlane.f32.xlu0 %v976_v47  ;;  %774 = vadd.xlane.f32.xlu1 %v773_v48  ;;  %v750_v48 = vsub.f32 %v2822_v45, %v730_v15 }
 0x276   : > { %v2944_v55 = vpop.xlane.xlu1 %735  ;;  %v759_v52 = vmul.f32 1.442695, %v750_v48 }
 0x278   : > { %v955_v58 = vpop.f32.mrf.mxu1 }
 0x279   : > { %v2906_v59 = vadd.f32 %v955_v58, %v649_v56  ;;  %v2936_v28 = vpop.eup %2461 }
 0x27a   : > { %v779_v29 = vsel %vm653_vm3, %v2936_v28, 0.0 }
 0x27b   : > { %v979_v61 = vsel %vm653_vm3, %v2906_v59, -inf }
 0x27c   : > { %980 = vmax.xlane.f32.xlu2 %v979_v61  ;;  %747 = vmax.xlane.f32.xlu1 %v746_v62 }
 0x27e   : > { %v739_v42 = vpop.xlane.xlu0 %738 }
 0x27f   : > { %v753_v62 = vsub.f32 %v2846_v1, %v739_v42 }
 0x280   : > { %v958_v0 = vpop.f32.mrf.mxu1 }
 0x281   : > { %v2915_v2 = vadd.f32 %v958_v0, %v650_v63 }
 0x283   : > { %v982_v3 = vsel %vm653_vm3, %v2915_v2, -inf }
 0x284   : > { %983 = vmax.xlane.f32.xlu1 %v982_v3 }
 0x286   : > { %v742_v18 = vpop.xlane.xlu2 %741 }
 0x288   : > { %v961_v5 = vpop.f32.mrf.mxu1 }
 0x289   : > { %v2922_v7 = vadd.f32 %v961_v5, %v651_v4 }
 0x28b   : > { %v985_v8 = vsel %vm653_vm3, %v2922_v7, -inf }
 0x28c   : > { %986 = vmax.xlane.f32.xlu0 %v985_v8 }
 0x28e   : > { %v745_v23 = vpop.xlane.xlu2 %744 }
 0x28f   : > { %v755_v26 = vsub.f32 %v2862_v12, %v745_v23 }
 0x290   : > { %v964_v11 = vpop.f32.mrf.mxu1 }
 0x291   : > { %v2929_v13 = vadd.f32 %v964_v11, %v652_v9  ;;  %v769_v27 = vmul.f32 1.442695, %v755_v26 }
 0x293   : > { %v988_v14 = vsel %vm653_vm3, %v2929_v13, -inf  ;;  %2463 = vpow2.f32 %v769_v27 }
 0x294   : > { %989 = vmax.xlane.f32.xlu0 %v988_v14  ;;  %2450 = vrot.lane.b32.xlu2 %v2794_v10, %s2599_s24 }
 0x299   : > { %v2940_v33 = vpop.eup %2463 }
 0x29a   : > { %v791_v36 = vsel %vm653_vm3, %v2940_v33, 0.0 }
 0x2bd   : > { %780 = vadd.xlane.f32.xlu2 %v779_v29 }
 0x2c5   : > { %792 = vadd.xlane.f32.xlu2 %v791_v36 }
 0x2cf   : > { %v969_v47 = vpop.xlane.xlu1 %968 }
 0x2d0   : > { %v991_v12 = vsub.f32 %v2869_v16, %v969_v47  ;;  %v765_v16 = vmul.f32 1.442695, %v753_v62 }
 0x2d2   : > { %v999_v50 = vmul.f32 1.442695, %v991_v12 }
 0x2d4   : > { %2465 = vpow2.f32 %v999_v50 }
 0x2d5   : > { %2467 = vpow2.f32 %v759_v52 }
 0x2d7   : > { %v972_v56 = vpop.xlane.xlu0 %971 }
 0x2d8   : > { %v992_v58 = vsub.f32 %v2876_v22, %v972_v56  ;;  %v754_v22 = vsub.f32 %v2854_v6, %v742_v18 }
 0x2da   : > { %v2949_v61 = vpop.eup %2465  ;;  %v1001_v63 = vmul.f32 1.442695, %v992_v58  ;;  %v767_v8 = vmul.f32 1.442695, %v754_v22 }
 0x2db   : > { %v1015_v0 = vsel %vm653_vm3, %v2949_v61, 0.0  ;;  %v2954_v3 = vpop.eup %2467 }
 0x2dc   : > { %2469 = vpow2.f32 %v1001_v63  ;;  %1016 = vadd.xlane.f32.xlu1 %v1015_v0  ;;  %v776_v1 = vsel %vm653_vm3, %v2954_v3, 0.0 }
 0x2dd   : > { %2471 = vpow2.f32 %v765_v16 }
 0x2de   : > { %2473 = vpow2.f32 %v767_v8 }
 0x2df   : > { %v975_v45 = vpop.xlane.xlu1 %974 }
 0x2e0   : > { %v993_v11 = vsub.f32 %v2883_v31, %v975_v45 }
 0x2e2   : > { %v2956_v4 = vpop.eup %2469  ;;  %v1003_v6 = vmul.f32 1.442695, %v993_v11 }
 0x2e3   : > { %v1018_v5 = vsel %vm653_vm3, %v2956_v4, 0.0  ;;  %v2963_v9 = vpop.eup %2471 }
 0x2e4   : > { %1019 = vadd.xlane.f32.xlu0 %v1018_v5  ;;  %777 = vadd.xlane.f32.xlu1 %v776_v1  ;;  %v785_v15 = vsel %vm653_vm3, %v2963_v9, 0.0  ;;  %v2970_v19 = vpop.eup %2473  ;;  %2475 = vpow2.f32 %v1003_v6 }
 0x2e5   : > { %v788_v23 = vsel %vm653_vm3, %v2970_v19, 0.0 }
 0x2e7   : > { %v2966_v14 = vpop.xlane.xlu1 %774  ;;  %v978_v17 = vpop.xlane.xlu0 %977 }
 0x2e8   : > { %v994_v20 = vsub.f32 %v2892_v43, %v978_v17 }
 0x2ea   : > { %v1005_v31 = vmul.f32 1.442695, %v994_v20  ;;  %v2975_v29 = vpop.eup %2475 }
 0x2eb   : > { %v1021_v43 = vsel %vm653_vm3, %v2975_v29, 0.0 }
 0x2ec   : > { %786 = vadd.xlane.f32.xlu1 %v785_v15  ;;  %2477 = vpow2.f32 %v1005_v31 }
 0x2ef   : > { %v981_v18 = vpop.xlane.xlu2 %980  ;;  %v748_v26 = vpop.xlane.xlu1 %747 }
 0x2f0   : > { %v995_v42 = vsub.f32 %v2906_v59, %v981_v18  ;;  %v756_v45 = vsub.f32 %v2904_v57, %v748_v26 }
 0x2f2   : > { %v1007_v12 = vmul.f32 1.442695, %v995_v42  ;;  %v2981_v50 = vpop.eup %2477 }
 0x2f4   : > { %789 = vadd.xlane.f32.xlu1 %v788_v23  ;;  %2479 = vpow2.f32 %v1007_v12 }
 0x2f7   : > { %v2451_v27 = vpop.permute.xlu2 %2450  ;;  %v984_v48 = vpop.xlane.xlu1 %983 }
 0x2f8   : > { %v2452_v36 = vunpack.i.l.bf16 %v2451_v27  ;;  %2455 = vrot.lane.b32.xlu0 %v2794_v10, %s2600_s25  ;;  %v2453_v47 = vunpack.i.h.bf16 %v2451_v27  ;;  %v996_v52 = vsub.f32 %v2915_v2, %v984_v48  ;;  %v1024_v10 = vsel %vm653_vm3, %v2981_v50, 0.0  ;;  %s3492_s25 = scalar_lea.vmem %s3554_s12, %s2423_s20 }
 0x2f9   : > { %v752_v2 = vsub.f32 %v2838_v60, %v2944_v55 }
 0x2fa   : > { %1099 = vmatpush.msra.mxu3 %v2452_v36  ;;  %v1009_v56 = vmul.f32 1.442695, %v996_v52  ;;  %v2986_v58 = vpop.eup %2479 }
 0x2fb   : > { %v1027_v63 = vsel %vm653_vm3, %v2986_v58, 0.0  ;;  %v763_v5 = vmul.f32 1.442695, %v752_v2 }
 0x2fc   : > { %1022 = vadd.xlane.f32.xlu1 %v1021_v43  ;;  %1100 = vmatpush.msra.mxu3 %v2453_v47  ;;  %2481 = vpow2.f32 %v1009_v56 }
 0x2ff   : > { %v987_v59 = vpop.xlane.xlu0 %986 }
 0x300   : > { %v997_v62 = vsub.f32 %v2922_v7, %v987_v59  ;;  %v771_v7 = vmul.f32 1.442695, %v756_v45 }
 0x302   : > { %v1011_v0 = vmul.f32 1.442695, %v997_v62  ;;  %v2991_v16 = vpop.eup %2481 }
 0x303   : > { %v1030_v22 = vsel %vm653_vm3, %v2991_v16, 0.0 }
 0x304   : > { %1025 = vadd.xlane.f32.xlu1 %v1024_v10  ;;  %2483 = vpow2.f32 %v1011_v0 }
 0x305   : > { %2485 = vpow2.f32 %v763_v5 }
 0x306   : > { %2487 = vpow2.f32 %v771_v7 }
 0x307   : > { %v990_v1 = vpop.xlane.xlu0 %989 }
 0x308   : > { %v998_v11 = vsub.f32 %v2929_v13, %v990_v1 }
 0x30a   : > { %v2998_v8 = vpop.eup %2483  ;;  %v1013_v60 = vmul.f32 1.442695, %v998_v11 }
 0x30b   : > { %v1033_v15 = vsel %vm653_vm3, %v2998_v8, 0.0  ;;  %v3003_v57 = vpop.eup %2485 }
 0x30c   : > { %1028 = vadd.xlane.f32.xlu1 %v1027_v63  ;;  %v3005_v55 = vpop.eup %2487  ;;  %2489 = vpow2.f32 %v1013_v60  ;;  %v782_v6 = vsel %vm653_vm3, %v3003_v57, 0.0 }
 0x30d   : > { %v794_v17 = vsel %vm653_vm3, %v3005_v55, 0.0 }
 0x312   : > { %v3011_v13 = vpop.eup %2489 }
 0x313   : > { %v1036_v18 = vsel %vm653_vm3, %v3011_v13, 0.0 }
 0x314   : > { %1031 = vadd.xlane.f32.xlu1 %v1030_v22 }
 0x31c   : > { %1034 = vadd.xlane.f32.xlu1 %v1033_v15 }
 0x322   : > { %783 = vadd.xlane.f32.xlu0 %v782_v6  ;;  %v1127_v6 = vld [vmem:[%s3547_s5 + $0x18] sm:$0xff] }
 0x324   : > { %795 = vadd.xlane.f32.xlu1 %v794_v17 }
 0x32a   : > { %1037 = vadd.xlane.f32.xlu0 %v1036_v18  ;;  %v1126_v18 = vld [vmem:[%s3547_s5 + $0x10] sm:$0xff] }
 0x330   : > { %v781_v59 = vpop.xlane.xlu2 %780 }
 0x34f   : > { %v1017_v20 = vpop.xlane.xlu1 %1016 }
 0x350   : > { %2491 = vrcp.f32 %v1017_v20 }
 0x356   : > { %v2492_v23 = vpop.eup %2491 }
 0x357   : > { %v1047_v26 = vmul.f32 %v2492_v23, %v2949_v61  ;;  %v1020_v31 = vpop.xlane.xlu0 %1019  ;;  %v778_v27 = vpop.xlane.xlu1 %777 }
 0x358   : > { %2493 = vrcp.f32 %v1020_v31 }
 0x359   : > { %2349 = vmatmul.msk.f32.vlgmr.msra.gmra.mxu3 %vm653_vm3, %v1047_v26  ;;  %2495 = vrcp.f32 %v2966_v14 }
 0x35a   : > { %2497 = vrcp.f32 %v778_v27 }
 0x35e   : > { %v2494_v36 = vpop.eup %2493 }
 0x35f   : > { %v787_v42 = vpop.xlane.xlu1 %786  ;;  %v1048_v47 = vmul.f32 %v2494_v36, %v2956_v4  ;;  %v2496_v48 = vpop.eup %2495 }
 0x360   : > { %v805_v61 = vmul.f32 %v2496_v48, %v2890_v39  ;;  %v2498_v4 = vpop.eup %2497 }
 0x361   : > { %2350 = vmatmul.msk.f32.gmra.mxu3 %vm653_vm3, %v1048_v47  ;;  %v806_v14 = vmul.f32 %v2498_v4, %v2954_v3 }
 0x367   : > { %v790_v43 = vpop.xlane.xlu1 %789 }
 0x36a   : > { %v2456_v12 = vpop.permute.xlu0 %2455 }
 0x36b   : > { %v2457_v52 = vunpack.i.l.bf16 %v2456_v12  ;;  %v2458_v10 = vunpack.i.h.bf16 %v2456_v12 }
 0x36d   : > { %857 = vmatpush.msra.mxu2 %v2457_v52 }
 0x36f   : > { %858 = vmatpush.msra.mxu2 %v2458_v10  ;;  %v1023_v56 = vpop.xlane.xlu1 %1022 }
 0x370   : > { %2499 = vrcp.f32 %v1023_v56  ;;  %2331 = vmatmul.msk.f32.vlgmr.msra.gmra.mxu2 %vm653_vm3, %v805_v61 }
 0x371   : > { %2501 = vrcp.f32 %v781_v59  ;;  %1166 = vmatpush.msrb.mxu2 %v1127_v6 }
 0x373   : > { %1167 = vmatpush.msrb.mxu2 %v1126_v18 }
 0x376   : > { %v2500_v62 = vpop.eup %2499 }
 0x377   : > { %v1026_v63 = vpop.xlane.xlu1 %1025  ;;  %v1049_v0 = vmul.f32 %v2500_v62, %v2975_v29  ;;  %v2502_v39 = vpop.eup %2501 }
 0x378   : > { %2503 = vrcp.f32 %v1026_v63  ;;  %2332 = vmatmul.msk.f32.gmra.mxu2 %vm653_vm3, %v806_v14  ;;  %v807_v45 = vmul.f32 %v2502_v39, %v2936_v28 }
 0x379   : > { %2351 = vmatmul.msk.f32.gmra.mxu3 %vm653_vm3, %v1049_v0 }
 0x37e   : > { %v2504_v2 = vpop.eup %2503 }
 0x37f   : > { %v1029_v22 = vpop.xlane.xlu1 %1028  ;;  %v1050_v5 = vmul.f32 %v2504_v2, %v2981_v50 }
 0x380   : > { %2505 = vrcp.f32 %v1029_v22  ;;  %2333 = vmatmul.msk.f32.gmra.mxu2 %vm653_vm3, %v807_v45  ;;  %v3077_v22 = vperm.slane %v2721_v21, 3 }
 0x381   : > { %2352 = vmatmul.msk.f32.gmra.mxu3 %vm653_vm3, %v1050_v5 }
 0x386   : > { %v2506_v3 = vpop.eup %2505 }
 0x387   : > { %v1032_v1 = vpop.xlane.xlu1 %1031  ;;  %v1051_v29 = vmul.f32 %v2506_v3, %v2986_v58 }
 0x388   : > { %2507 = vrcp.f32 %v1032_v1 }
 0x389   : > { %2353 = vmatmul.msk.f32.gmra.mxu3 %vm653_vm3, %v1051_v29 }
 0x38e   : > { %v2508_v7 = vpop.eup %2507 }
 0x38f   : > { %v1035_v11 = vpop.xlane.xlu1 %1034  ;;  %v1052_v15 = vmul.f32 %v2508_v7, %v2991_v16 }
 0x390   : > { %2509 = vrcp.f32 %v1035_v11 }
 0x391   : > { %2354 = vmatmul.msk.f32.gmra.mxu3 %vm653_vm3, %v1052_v15 }
 0x395   : > { %v784_v28 = vpop.xlane.xlu0 %783 }
 0x396   : > { %v2510_v50 = vpop.eup %2509  ;;  %2511 = vrcp.f32 %v784_v28 }
 0x397   : > { %v1053_v60 = vmul.f32 %v2510_v50, %v2998_v8  ;;  %2513 = vrcp.f32 %v787_v42  ;;  %v796_v36 = vpop.xlane.xlu1 %795 }
 0x399   : > { %2355 = vmatmul.msk.f32.gmra.mxu3 %vm653_vm3, %v1053_v60 }
 0x39c   : > { %v2512_v58 = vpop.eup %2511 }
 0x39d   : > { %v1038_v17 = vpop.xlane.xlu0 %1037  ;;  %v808_v16 = vmul.f32 %v2512_v58, %v3003_v57  ;;  %v2514_v8 = vpop.eup %2513 }
 0x39e   : > { %2515 = vrcp.f32 %v1038_v17  ;;  %v809_v23 = vmul.f32 %v2514_v8, %v2963_v9  ;;  %v793_v57 = vpop.xlane.xlu2 %792 }
 0x39f   : > { %2334 = vmatmul.msk.f32.gmra.mxu2 %vm653_vm3, %v808_v16  ;;  %2517 = vrcp.f32 %v790_v43  ;;  %v885_v43 = vld [vmem:[%s3547_s5 + $0x8] sm:$0xff] }
 0x3a0   : > { %2519 = vrcp.f32 %v793_v57  ;;  %1231 = vmatpush.msra.mxu0 %v885_v43 }
 0x3a1   : > { %2521 = vrcp.f32 %v796_v36 }
 0x3a4   : > { %v2516_v20 = vpop.eup %2515 }
 0x3a5   : > { %v1054_v26 = vmul.f32 %v2516_v20, %v3011_v13  ;;  %v2518_v31 = vpop.eup %2517 }
 0x3a6   : > { %v810_v27 = vmul.f32 %v2518_v31, %v2970_v19  ;;  %v2520_v42 = vpop.eup %2519  ;;  %v884_v19 = vld [vmem:[%s3547_s5] sm:$0xff] }
 0x3a7   : > { %2335 = vmatmul.msk.f32.gmra.mxu2 %vm653_vm3, %v809_v23  ;;  %2356 = vmatmul.msk.f32.gmra.mxu3 %vm653_vm3, %v1054_v26  ;;  %v811_v47 = vmul.f32 %v2520_v42, %v2940_v33  ;;  %v2522_v9 = vpop.eup %2521 }
 0x3a8   : > { %v812_v13 = vmul.f32 %v2522_v9, %v3005_v55  ;;  %1232 = vmatpush.msra.mxu0 %v884_v19 }
 0x3af   : > { %2336 = vmatmul.msk.f32.gmra.mxu2 %vm653_vm3, %v810_v27 }
 0x3b7   : > { %2337 = vmatmul.msk.f32.gmra.mxu2 %vm653_vm3, %v811_v47 }
 0x3bf   : > { %2338 = vmatmul.msk.f32.gmra.mxu2 %vm653_vm3, %v812_v13 }
 0x3dc   : > { %v1102_v12 = vpop.f32.mrf.mxu3 }
 0x3dd   : > { %2357 = vmatmul.msk.f32.vlgmr.msrb.gmra.mxu2 %vm653_vm3, %v1102_v12 }
 0x3e4   : > { %v1105_v33 = vpop.f32.mrf.mxu3 }
 0x3e5   : > { %2358 = vmatmul.msk.f32.gmra.mxu2 %vm653_vm3, %v1105_v33  ;;  %v2601_v33 = vmov 32.0  }
 0x3e6   : > { %2523 = vrcp.f32 %v2601_v33 }
 0x3f3   : > { %v860_v48 = vpop.f32.mrf.mxu2 }
 0x3f4   : > { %2365 = vmatmul.msk.f32.vlgmr.msra.gmra.mxu0 %vm653_vm3, %v860_v48  ;;  %v2524_v48 = vpop.eup %2523 }
 0x3f5   : > { %vm1304_vm4 = vweird.f32 %v2524_v48 }
 0x3fb   : > { %v863_v55 = vpop.f32.mrf.mxu2 }
 0x3fc   : > { %v1108_v52 = vpop.f32.mrf.mxu3  ;;  %2366 = vmatmul.msk.f32.gmra.mxu0 %vm653_vm3, %v863_v55  ;;  %v1300_v55 = vmul.f32 32.0, %v2524_v48 }
 0x3fd   : > { %2359 = vmatmul.msk.f32.gmra.mxu2 %vm653_vm3, %v1108_v52 }
 0x3fe   : > { %v1301_v44 = vsub.f32 1.0, %v1300_v55 }
 0x403   : > { %v866_v10 = vpop.f32.mrf.mxu2 }
 0x404   : > { %v1111_v61 = vpop.f32.mrf.mxu3  ;;  %2367 = vmatmul.msk.f32.gmra.mxu0 %vm653_vm3, %v866_v10 }
 0x405   : > { %2360 = vmatmul.msk.f32.gmra.mxu2 %vm653_vm3, %v1111_v61 }
 0x40c   : > { %v1114_v56 = vpop.f32.mrf.mxu3 }
 0x40d   : > { %2361 = vmatmul.msk.f32.gmra.mxu2 %vm653_vm3, %v1114_v56 }
 0x414   : > { %v1117_v59 = vpop.f32.mrf.mxu3 }
 0x415   : > { %2362 = vmatmul.msk.f32.gmra.mxu2 %vm653_vm3, %v1117_v59 }
 0x41c   : > { %v1120_v4 = vpop.f32.mrf.mxu3 }
 0x41d   : > { %2363 = vmatmul.msk.f32.gmra.mxu2 %vm653_vm3, %v1120_v4 }
 0x422   : > { %v869_v62 = vpop.f32.mrf.mxu2 }
 0x423   : > { %2368 = vmatmul.msk.f32.gmra.mxu0 %vm653_vm3, %v869_v62 }
 0x42a   : > { %v872_v14 = vpop.f32.mrf.mxu2  ;;  %v1123_v63 = vpop.f32.mrf.mxu3 }
 0x42b   : > { %2364 = vmatmul.msk.f32.gmra.mxu2 %vm653_vm3, %v1123_v63  ;;  %2369 = vmatmul.msk.f32.gmra.mxu0 %vm653_vm3, %v872_v14 }
 0x432   : > { %v875_v0 = vpop.f32.mrf.mxu2 }
 0x433   : > { %2370 = vmatmul.msk.f32.gmra.mxu0 %vm653_vm3, %v875_v0 }
 0x43a   : > { %v878_v39 = vpop.f32.mrf.mxu2 }
 0x43b   : > { %2371 = vmatmul.msk.f32.gmra.mxu0 %vm653_vm3, %v878_v39 }
 0x442   : > { %v881_v2 = vpop.f32.mrf.mxu2 }
 0x443   : > { %2372 = vmatmul.msk.f32.gmra.mxu0 %vm653_vm3, %v881_v2 }
 0x460   : > { %v1169_v45 = vpop.f32.mrf.mxu2 }
 0x468   : > { %v1172_v7 = vpop.f32.mrf.mxu2 }
 0x471   : > { %v1234_v5 = vpop.f32.mrf.mxu0 }
 0x472   : > { %v1235_v3 = vadd.f32 %v1234_v5, %v1169_v45 }
 0x474   : > { %v1259_v1 = vadd.f32 %v3077_v22, %v1235_v3 }
 0x476   : > { %v1267_v29 = vadd.f32 %v1259_v1, %v516_v25 }
 0x478   : > { %v1275_v11 = vsel %vm529_vm2, %v1267_v29, 0.0 }
 0x479   : > { %v1237_v15 = vpop.f32.mrf.mxu0  ;;  %1276 = vadd.xlane.f32.xlu2 %v1275_v11 }
 0x47a   : > { %v1238_v28 = vadd.f32 %v1237_v15, %v1172_v7  ;;  %v1479_v15 = vld [vmem:[%s3548_s6 + $0x18] sm:$0xff] }
 0x47b   : > { %1517 = vmatpush.msra.mxu1 %v1479_v15 }
 0x47c   : > { %v1260_v50 = vadd.f32 %v3077_v22, %v1238_v28  ;;  %v1478_v28 = vld [vmem:[%s3548_s6 + $0x10] sm:$0xff] }
 0x47d   : > { %1518 = vmatpush.msra.mxu1 %v1478_v28 }
 0x47e   : > { %v1268_v60 = vadd.f32 %v1260_v50, %v517_v32 }
 0x480   : > { %v1175_v21 = vpop.f32.mrf.mxu2  ;;  %v1278_v6 = vsel %vm529_vm2, %v1268_v60, 0.0 }
 0x481   : > { %v1240_v58 = vpop.f32.mrf.mxu0  ;;  %1279 = vadd.xlane.f32.xlu0 %v1278_v6 }
 0x482   : > { %v1241_v17 = vadd.f32 %v1240_v58, %v1175_v21 }
 0x484   : > { %v1261_v24 = vadd.f32 %v3077_v22, %v1241_v17 }
 0x486   : > { %v1269_v25 = vadd.f32 %v1261_v24, %v518_v35 }
 0x488   : > { %v1281_v16 = vsel %vm529_vm2, %v1269_v25, 0.0  ;;  %v1178_v18 = vpop.f32.mrf.mxu2 }
 0x489   : > { %1282 = vadd.xlane.f32.xlu1 %v1281_v16 }
 0x490   : > { %v1181_v32 = vpop.f32.mrf.mxu2 }
 0x498   : > { %v1184_v27 = vpop.f32.mrf.mxu2 }
 0x4a0   : > { %v1243_v8 = vpop.f32.mrf.mxu0  ;;  %v1187_v13 = vpop.f32.mrf.mxu2 }
 0x4a1   : > { %v1244_v20 = vadd.f32 %v1243_v8, %v1178_v18 }
 0x4a3   : > { %v1262_v30 = vadd.f32 %v3077_v22, %v1244_v20 }
 0x4a5   : > { %v1270_v23 = vadd.f32 %v1262_v30, %v519_v38 }
 0x4a7   : > { %v1284_v26 = vsel %vm529_vm2, %v1270_v23, 0.0 }
 0x4a8   : > { %v1246_v57 = vpop.f32.mrf.mxu0  ;;  %1285 = vadd.xlane.f32.xlu2 %v1284_v26 }
 0x4a9   : > { %v1247_v31 = vadd.f32 %v1246_v57, %v1181_v32 }
 0x4ab   : > { %v1263_v34 = vadd.f32 %v3077_v22, %v1247_v31 }
 0x4ad   : > { %v3098_v35 = vadd.f32 %v1263_v34, %v520_v41 }
 0x4ae   : > { %v1190_v4 = vpop.f32.mrf.mxu2 }
 0x4af   : > { %v1287_v36 = vsel %vm529_vm2, %v3098_v35, 0.0 }
 0x4b0   : > { %v1249_v42 = vpop.f32.mrf.mxu0  ;;  %1288 = vadd.xlane.f32.xlu0 %v1287_v36 }
 0x4b1   : > { %v1250_v47 = vadd.f32 %v1249_v42, %v1184_v27  ;;  %v1476_v27 = vld [vmem:[%s3548_s6] sm:$0xff] }
 0x4b3   : > { %v1264_v37 = vadd.f32 %v3077_v22, %v1250_v47 }
 0x4b5   : > { %v1272_v38 = vadd.f32 %v1264_v37, %v521_v46  ;;  %v1302_v46 = vmul.f32 %v2524_v48, %v1301_v44 }
 0x4b7   : > { %v1290_v9 = vsel %vm529_vm2, %v1272_v38, 0.0  ;;  %v1303_v52 = vadd.f32 %v2524_v48, %v1302_v46 }
 0x4b8   : > { %v1252_v43 = vpop.f32.mrf.mxu0  ;;  %1291 = vadd.xlane.f32.xlu1 %v1290_v9 }
 0x4b9   : > { %v1253_v40 = vadd.f32 %v1252_v43, %v1187_v13  ;;  %v3110_v10 = vsel %vm1304_vm4, %v2524_v48, %v1303_v52 }
 0x4bb   : > { %v1265_v41 = vadd.f32 %v3077_v22, %v1253_v40 }
 0x4bd   : > { %v1273_v19 = vadd.f32 %v1265_v41, %v522_v51 }
 0x4bf   : > { %v1293_v12 = vsel %vm529_vm2, %v1273_v19, 0.0 }
 0x4c0   : > { %1294 = vadd.xlane.f32.xlu0 %v1293_v12  ;;  %v1255_v61 = vpop.f32.mrf.mxu0 }
 0x4c1   : > { %v1256_v49 = vadd.f32 %v1255_v61, %v1190_v4 }
 0x4c3   : > { %v1266_v14 = vadd.f32 %v3077_v22, %v1256_v49  ;;  %v3183_v49 = vld [vmem:[%s3553_s11] sm:$0xff] }
 0x4c5   : > { %v1274_v45 = vadd.f32 %v1266_v14, %v523_v54 }
 0x4c7   : > { %v1296_v1 = vsel %vm529_vm2, %v1274_v45, 0.0 }
 0x4ec   : > { %v1277_v56 = vpop.xlane.xlu2 %1276 }
 0x4ed   : > { %v1306_v59 = vmul.f32 %v3110_v10, %v1277_v56 }
 0x4ef   : > { %v3113_v51 = vsub.f32 %v1267_v29, %v1306_v59 }
 0x4f1   : > { %v1322_v62 = vmul.f32 %v3113_v51, %v3113_v51 }
 0x4f3   : > { %v1330_v63 = vsel %vm529_vm2, %v1322_v62, 0.0  ;;  %v3186_v62 = vperm.slane %v3183_v49, 4 }
 0x4f4   : > { %v1280_v0 = vpop.xlane.xlu0 %1279  ;;  %1331 = vadd.xlane.f32.xlu2 %v1330_v63 }
 0x4f5   : > { %v1307_v39 = vmul.f32 %v3110_v10, %v1280_v0 }
 0x4f7   : > { %v3120_v2 = vsub.f32 %v1268_v60, %v1307_v39  ;;  %v3190_v39 = vperm.slane %v3183_v49, 5 }
 0x4f9   : > { %v1323_v5 = vmul.f32 %v3120_v2, %v3120_v2 }
 0x4fb   : > { %v1333_v3 = vsel %vm529_vm2, %v1323_v5, 0.0 }
 0x4fc   : > { %v1283_v29 = vpop.xlane.xlu1 %1282  ;;  %1334 = vadd.xlane.f32.xlu1 %v1333_v3  ;;  %1297 = vadd.xlane.f32.xlu2 %v1296_v1 }
 0x4fd   : > { %v1308_v22 = vmul.f32 %v3110_v10, %v1283_v29 }
 0x4ff   : > { %v3129_v7 = vsub.f32 %v1269_v25, %v1308_v22 }
 0x501   : > { %v1324_v11 = vmul.f32 %v3129_v7, %v3129_v7 }
 0x503   : > { %v1336_v53 = vsel %vm529_vm2, %v1324_v11, 0.0 }
 0x504   : > { %1337 = vadd.xlane.f32.xlu0 %v1336_v53 }
 0x51b   : > { %v1286_v54 = vpop.xlane.xlu2 %1285 }
 0x51c   : > { %v1309_v50 = vmul.f32 %v3110_v10, %v1286_v54 }
 0x51e   : > { %v3141_v60 = vsub.f32 %v1270_v23, %v1309_v50 }
 0x520   : > { %v1325_v21 = vmul.f32 %v3141_v60, %v3141_v60 }
 0x522   : > { %v1339_v6 = vsel %vm529_vm2, %v1325_v21, 0.0 }
 0x523   : > { %v1289_v58 = vpop.xlane.xlu0 %1288  ;;  %1340 = vadd.xlane.f32.xlu1 %v1339_v6 }
 0x524   : > { %v1310_v17 = vmul.f32 %v3110_v10, %v1289_v58 }
 0x526   : > { %v3148_v24 = vsub.f32 %v3098_v35, %v1310_v17  ;;  %v1477_v35 = vld [vmem:[%s3548_s6 + $0x8] sm:$0xff] }
 0x527   : > { %1519 = vmatpush.msra.mxu1 %v1477_v35 }
 0x528   : > { %v1326_v25 = vmul.f32 %v3148_v24, %v3148_v24 }
 0x529   : > { %1520 = vmatpush.msra.mxu1 %v1476_v27 }
 0x52a   : > { %v1342_v16 = vsel %vm529_vm2, %v1326_v25, 0.0 }
 0x52b   : > { %v1292_v18 = vpop.xlane.xlu1 %1291  ;;  %1343 = vadd.xlane.f32.xlu2 %v1342_v16 }
 0x52c   : > { %v1311_v8 = vmul.f32 %v3110_v10, %v1292_v18 }
 0x52e   : > { %v3154_v20 = vsub.f32 %v1272_v38, %v1311_v8 }
 0x530   : > { %v1327_v30 = vmul.f32 %v3154_v20, %v3154_v20 }
 0x532   : > { %v1345_v32 = vsel %vm529_vm2, %v1327_v30, 0.0 }
 0x533   : > { %1346 = vadd.xlane.f32.xlu0 %v1345_v32  ;;  %v1295_v23 = vpop.xlane.xlu0 %1294 }
 0x534   : > { %v1312_v26 = vmul.f32 %v3110_v10, %v1295_v23 }
 0x536   : > { %v3160_v57 = vsub.f32 %v1273_v19, %v1312_v26 }
 0x538   : > { %v1328_v31 = vmul.f32 %v3160_v57, %v3160_v57 }
 0x53a   : > { %v1348_v34 = vsel %vm529_vm2, %v1328_v31, 0.0 }
 0x53b   : > { %1349 = vadd.xlane.f32.xlu1 %v1348_v34 }
 0x567   : > { %v1332_v36 = vpop.xlane.xlu2 %1331 }
 0x568   : > { %v1354_v42 = vmul.f32 %v1332_v36, %v3110_v10 }
 0x56a   : > { %v1362_v47 = vadd.f32 1e-05, %v1354_v42 }
 0x56c   : > { %2525 = vrsqrt.f32 %v1362_v47  ;;  %vm1376_vm6 = vweird.f32 %v1362_v47 }
 0x56f   : > { %v1335_v37 = vpop.xlane.xlu1 %1334  ;;  %v1298_v38 = vpop.xlane.xlu2 %1297 }
 0x570   : > { %v1355_v9 = vmul.f32 %v1335_v37, %v3110_v10  ;;  %v1313_v13 = vmul.f32 %v3110_v10, %v1298_v38 }
 0x572   : > { %v2526_v43 = vpop.eup %2525  ;;  %v1363_v40 = vadd.f32 1e-05, %v1355_v9  ;;  %v3174_v41 = vsub.f32 %v1274_v45, %v1313_v13  ;;  %v1561_v9 = vld [vmem:[%s3549_s7 + $0x38] sm:$0xff]  ;;  %v1560_v13 = vld [vmem:[%s3549_s7 + $0x30] sm:$0xff] }
 0x573   : > { %v1371_v19 = vmul.f32 %v2526_v43, %v1362_v47  ;;  %vm1377_vm5 = vweird.f32 %v2526_v43  ;;  %1596 = vmatpush.msrb.mxu3 %v1561_v9 }
 0x574   : > { %2527 = vrsqrt.f32 %v1363_v40  ;;  %v1329_v12 = vmul.f32 %v3174_v41, %v3174_v41  ;;  %vm1378_vm7 = vmor %vm1376_vm6, %vm1377_vm5  ;;  %vm1386_vm9 = vweird.f32 %v1363_v40 }
 0x575   : > { %v1372_v33 = vmul.f32 %v2526_v43, %v1371_v19  ;;  %1597 = vmatpush.msrb.mxu3 %v1560_v13 }
 0x576   : > { %v1351_v48 = vsel %vm529_vm2, %v1329_v12, 0.0  ;;  %v1559_v12 = vld [vmem:[%s3549_s7 + $0x28] sm:$0xff] }
 0x577   : > { %v1373_v55 = vmul.f32 0.5, %v1372_v33  ;;  %v1338_v44 = vpop.xlane.xlu0 %1337  ;;  %1352 = vadd.xlane.f32.xlu2 %v1351_v48  ;;  %1598 = vmatpush.msrb.mxu3 %v1559_v12 }
 0x578   : > { %v1356_v46 = vmul.f32 %v1338_v44, %v3110_v10 }
 0x579   : > { %v1374_v52 = vsub.f32 1.5, %v1373_v55 }
 0x57a   : > { %v2528_v61 = vpop.eup %2527  ;;  %v1364_v56 = vadd.f32 1e-05, %v1356_v46 }
 0x57b   : > { %v1375_v59 = vmul.f32 %v2526_v43, %v1374_v52  ;;  %v1381_v4 = vmul.f32 %v2528_v61, %v1363_v40  ;;  %vm1387_vm8 = vweird.f32 %v2528_v61 }
 0x57c   : > { %2529 = vrsqrt.f32 %v1364_v56  ;;  %vm1388_vm10 = vmor %vm1386_vm9, %vm1387_vm8  ;;  %vm1396_vm12 = vweird.f32 %v1364_v56 }
 0x57d   : > { %v1379_v14 = vsel %vm1378_vm7, %v2526_v43, %v1375_v59  ;;  %v1382_v63 = vmul.f32 %v2528_v61, %v1381_v4 }
 0x57e   : > { %v1450_v0 = vmul.f32 %v1379_v14, %v3113_v51 }
 0x57f   : > { %v1383_v45 = vmul.f32 0.5, %v1382_v63 }
 0x580   : > { %v1459_v5 = vmul.f32 %v3186_v62, %v1450_v0 }
 0x581   : > { %v1384_v3 = vsub.f32 1.5, %v1383_v45 }
 0x582   : > { %v2530_v1 = vpop.eup %2529  ;;  %v3194_v29 = vadd.f32 %v3190_v39, %v1459_v5 }
 0x583   : > { %v1385_v22 = vmul.f32 %v2528_v61, %v1384_v3  ;;  %v1391_v11 = vmul.f32 %v2530_v1, %v1364_v56  ;;  %vm1397_vm11 = vweird.f32 %v2530_v1 }
 0x584   : > { %2373 = vmatmul.msk.f32.vlgmr.msra.gmra.mxu1 %vm529_vm2, %v3194_v29  ;;  %vm1398_vm13 = vmor %vm1396_vm12, %vm1397_vm11 }
 0x585   : > { %v1389_v51 = vsel %vm1388_vm10, %v2528_v61, %v1385_v22  ;;  %v1392_v53 = vmul.f32 %v2530_v1, %v1391_v11 }
 0x586   : > { %v1451_v54 = vmul.f32 %v1389_v51, %v3120_v2 }
 0x587   : > { %v1393_v15 = vmul.f32 0.5, %v1392_v53 }
 0x588   : > { %v1460_v28 = vmul.f32 %v3186_v62, %v1451_v54 }
 0x589   : > { %v1394_v50 = vsub.f32 1.5, %v1393_v15 }
 0x58a   : > { %v3201_v21 = vadd.f32 %v3190_v39, %v1460_v28 }
 0x58b   : > { %v1395_v6 = vmul.f32 %v2530_v1, %v1394_v50 }
 0x58c   : > { %2374 = vmatmul.msk.f32.gmra.mxu1 %vm529_vm2, %v3201_v21 }
 0x58d   : > { %v1399_v58 = vsel %vm1398_vm13, %v2530_v1, %v1395_v6 }
 0x58e   : > { %v1452_v17 = vmul.f32 %v1399_v58, %v3129_v7 }
 0x590   : > { %v1461_v25 = vmul.f32 %v3186_v62, %v1452_v17 }
 0x592   : > { %v3208_v2 = vadd.f32 %v3190_v39, %v1461_v25 }
 0x594   : > { %2375 = vmatmul.msk.f32.gmra.mxu1 %vm529_vm2, %v3208_v2 }
 0x596   : > { %v1341_v16 = vpop.xlane.xlu1 %1340 }
 0x597   : > { %v1357_v18 = vmul.f32 %v1341_v16, %v3110_v10  ;;  %v1558_v16 = vld [vmem:[%s3549_s7 + $0x20] sm:$0xff] }
 0x598   : > { %1599 = vmatpush.msrb.mxu3 %v1558_v16 }
 0x599   : > { %v1365_v8 = vadd.f32 1e-05, %v1357_v18  ;;  %v1557_v18 = vld [vmem:[%s3549_s7 + $0x18] sm:$0xff] }
 0x59a   : > { %1600 = vmatpush.msrb.mxu3 %v1557_v18 }
 0x59b   : > { %2531 = vrsqrt.f32 %v1365_v8  ;;  %vm1406_vm15 = vweird.f32 %v1365_v8 }
 0x59e   : > { %v1344_v30 = vpop.xlane.xlu2 %1343 }
 0x59f   : > { %v1358_v32 = vmul.f32 %v1344_v30, %v3110_v10  ;;  %v1554_v30 = vld [vmem:[%s3549_s7] sm:$0xff] }
 0x5a1   : > { %v2532_v23 = vpop.eup %2531  ;;  %v1366_v26 = vadd.f32 1e-05, %v1358_v32 }
 0x5a2   : > { %v1401_v31 = vmul.f32 %v2532_v23, %v1365_v8  ;;  %vm1407_vm14 = vweird.f32 %v2532_v23  ;;  %v1555_v8 = vld [vmem:[%s3549_s7 + $0x8] sm:$0xff] }
 0x5a3   : > { %2533 = vrsqrt.f32 %v1366_v26  ;;  %vm1408_vm0 = vmor %vm1406_vm15, %vm1407_vm14  ;;  %vm1416_vm3 = vweird.f32 %v1366_v26  ;;  %vm1563_vm14 = vcmask 523264  }
 0x5a4   : > { %v1402_v7 = vmul.f32 %v2532_v23, %v1401_v31 }
 0x5a6   : > { %v1403_v34 = vmul.f32 0.5, %v1402_v7  ;;  %v1347_v35 = vpop.xlane.xlu0 %1346 }
 0x5a7   : > { %v1359_v27 = vmul.f32 %v1347_v35, %v3110_v10 }
 0x5a8   : > { %v1404_v36 = vsub.f32 1.5, %v1403_v34 }
 0x5a9   : > { %v2534_v42 = vpop.eup %2533  ;;  %v1367_v47 = vadd.f32 1e-05, %v1359_v27 }
 0x5aa   : > { %v1405_v37 = vmul.f32 %v2532_v23, %v1404_v36  ;;  %v1411_v38 = vmul.f32 %v2534_v42, %v1366_v26  ;;  %vm1417_vm1 = vweird.f32 %v2534_v42 }
 0x5ab   : > { %2535 = vrsqrt.f32 %v1367_v47  ;;  %vm1418_vm4 = vmor %vm1416_vm3, %vm1417_vm1  ;;  %vm1426_vm6 = vweird.f32 %v1367_v47 }
 0x5ac   : > { %v1409_v43 = vsel %vm1408_vm0, %v2532_v23, %v1405_v37  ;;  %v1412_v40 = vmul.f32 %v2534_v42, %v1411_v38 }
 0x5ad   : > { %v1453_v19 = vmul.f32 %v1409_v43, %v3141_v60 }
 0x5ae   : > { %v1413_v33 = vmul.f32 0.5, %v1412_v40  ;;  %v1350_v48 = vpop.xlane.xlu1 %1349 }
 0x5af   : > { %v1360_v55 = vmul.f32 %v1350_v48, %v3110_v10  ;;  %v1462_v44 = vmul.f32 %v3186_v62, %v1453_v19 }
 0x5b0   : > { %v1414_v46 = vsub.f32 1.5, %v1413_v33 }
 0x5b1   : > { %v2536_v52 = vpop.eup %2535  ;;  %v1368_v61 = vadd.f32 1e-05, %v1360_v55  ;;  %v3228_v56 = vadd.f32 %v3190_v39, %v1462_v44 }
 0x5b2   : > { %v1415_v60 = vmul.f32 %v2534_v42, %v1414_v46  ;;  %v1421_v59 = vmul.f32 %v2536_v52, %v1367_v47  ;;  %vm1427_vm5 = vweird.f32 %v2536_v52 }
 0x5b3   : > { %2537 = vrsqrt.f32 %v1368_v61  ;;  %2376 = vmatmul.msk.f32.gmra.mxu1 %vm529_vm2, %v3228_v56  ;;  %vm1428_vm7 = vmor %vm1426_vm6, %vm1427_vm5  ;;  %vm1436_vm9 = vweird.f32 %v1368_v61 }
 0x5b4   : > { %v1419_v4 = vsel %vm1418_vm4, %v2534_v42, %v1415_v60  ;;  %v1422_v14 = vmul.f32 %v2536_v52, %v1421_v59  ;;  %v1480_v42 = vperm.slane %v3183_v49, 6 }
 0x5b5   : > { %v1454_v63 = vmul.f32 %v1419_v4, %v3148_v24 }
 0x5b6   : > { %v1423_v0 = vmul.f32 0.5, %v1422_v14 }
 0x5b7   : > { %v1463_v45 = vmul.f32 %v3186_v62, %v1454_v63 }
 0x5b8   : > { %v1424_v5 = vsub.f32 1.5, %v1423_v0 }
 0x5b9   : > { %v2538_v3 = vpop.eup %2537  ;;  %v3235_v1 = vadd.f32 %v3190_v39, %v1463_v45 }
 0x5ba   : > { %v1425_v22 = vmul.f32 %v2536_v52, %v1424_v5  ;;  %v1431_v11 = vmul.f32 %v2538_v3, %v1368_v61  ;;  %vm1437_vm8 = vweird.f32 %v2538_v3 }
 0x5bb   : > { %2377 = vmatmul.msk.f32.gmra.mxu1 %vm529_vm2, %v3235_v1  ;;  %vm1438_vm10 = vmor %vm1436_vm9, %vm1437_vm8 }
 0x5bc   : > { %v1429_v51 = vsel %vm1428_vm7, %v2536_v52, %v1425_v22  ;;  %v1432_v53 = vmul.f32 %v2538_v3, %v1431_v11 }
 0x5bd   : > { %v1455_v24 = vmul.f32 %v1429_v51, %v3154_v20 }
 0x5be   : > { %v1433_v54 = vmul.f32 0.5, %v1432_v53 }
 0x5bf   : > { %v1464_v15 = vmul.f32 %v3186_v62, %v1455_v24 }
 0x5c0   : > { %v1434_v28 = vsub.f32 1.5, %v1433_v54 }
 0x5c1   : > { %v3242_v50 = vadd.f32 %v3190_v39, %v1464_v15 }
 0x5c2   : > { %v1435_v6 = vmul.f32 %v2538_v3, %v1434_v28 }
 0x5c3   : > { %2378 = vmatmul.msk.f32.gmra.mxu1 %vm529_vm2, %v3242_v50 }
 0x5c4   : > { %v1439_v58 = vsel %vm1438_vm10, %v2538_v3, %v1435_v6  ;;  %v1562_v3 = vperm.slane %v3183_v49, 7 }
 0x5c5   : > { %v1456_v17 = vmul.f32 %v1439_v58, %v3160_v57  ;;  %v1556_v57 = vld [vmem:[%s3549_s7 + $0x10] sm:$0xff] }
 0x5c6   : > { %1601 = vmatpush.msrb.mxu3 %v1556_v57 }
 0x5c7   : > { %v1465_v25 = vmul.f32 %v3186_v62, %v1456_v17 }
 0x5c8   : > { %1602 = vmatpush.msrb.mxu3 %v1555_v8 }
 0x5c9   : > { %v3249_v20 = vadd.f32 %v3190_v39, %v1465_v25 }
 0x5ca   : > { %1603 = vmatpush.msrb.mxu3 %v1554_v30 }
 0x5cb   : > { %2379 = vmatmul.msk.f32.gmra.mxu1 %vm529_vm2, %v3249_v20 }
 0x5ea   : > { %v1353_v32 = vpop.xlane.xlu2 %1352 }
 0x5eb   : > { %v1361_v23 = vmul.f32 %v1353_v32, %v3110_v10 }
 0x5ed   : > { %v1369_v26 = vadd.f32 1e-05, %v1361_v23 }
 0x5ef   : > { %2539 = vrsqrt.f32 %v1369_v26  ;;  %vm1446_vm12 = vweird.f32 %v1369_v26 }
 0x5f5   : > { %v2540_v31 = vpop.eup %2539 }
 0x5f6   : > { %v1441_v7 = vmul.f32 %v2540_v31, %v1369_v26  ;;  %vm1447_vm11 = vweird.f32 %v2540_v31 }
 0x5f7   : > { %vm1448_vm13 = vmor %vm1446_vm12, %vm1447_vm11 }
 0x5f8   : > { %v1442_v34 = vmul.f32 %v2540_v31, %v1441_v7 }
 0x5fa   : > { %v1443_v35 = vmul.f32 0.5, %v1442_v34 }
 0x5fc   : > { %v1444_v27 = vsub.f32 1.5, %v1443_v35 }
 0x5fe   : > { %v1445_v36 = vmul.f32 %v2540_v31, %v1444_v27 }
 0x600   : > { %v1449_v47 = vsel %vm1448_vm13, %v2540_v31, %v1445_v36 }
 0x601   : > { %v1522_v37 = vpop.f32.mrf.mxu1  ;;  %v1457_v38 = vmul.f32 %v1449_v47, %v3174_v41 }
 0x602   : > { %v1523_v9 = vadd.f32 %v1522_v37, %v1480_v42 }
 0x603   : > { %v1466_v13 = vmul.f32 %v3186_v62, %v1457_v38 }
 0x604   : > { %v1546_v43 = vmax.f32 %v1523_v9, 0.0 }
 0x605   : > { %v3273_v40 = vadd.f32 %v3190_v39, %v1466_v13 }
 0x606   : > { %2381 = vmatmul.msk.f32.vlgmr.msrb.gmra.mxu3 %vm1563_vm14, %v1546_v43 }
 0x607   : > { %2380 = vmatmul.msk.f32.gmra.mxu1 %vm529_vm2, %v3273_v40 }
 0x609   : > { %v1525_v19 = vpop.f32.mrf.mxu1 }
 0x60a   : > { %v1526_v12 = vadd.f32 %v1525_v19, %v1480_v42 }
 0x60c   : > { %v1547_v33 = vmax.f32 %v1526_v12, 0.0 }
 0x60e   : > { %2382 = vmatmul.msk.f32.gmra.mxu3 %vm1563_vm14, %v1547_v33 }
 0x611   : > { %v1528_v48 = vpop.f32.mrf.mxu1 }
 0x612   : > { %v1529_v41 = vadd.f32 %v1528_v48, %v1480_v42 }
 0x614   : > { %v1548_v55 = vmax.f32 %v1529_v41, 0.0 }
 0x616   : > { %2383 = vmatmul.msk.f32.gmra.mxu3 %vm1563_vm14, %v1548_v55 }
 0x630   : > { %v1531_v62 = vpop.f32.mrf.mxu1 }
 0x631   : > { %v1532_v44 = vadd.f32 %v1531_v62, %v1480_v42 }
 0x633   : > { %v1549_v46 = vmax.f32 %v1532_v44, 0.0 }
 0x635   : > { %2384 = vmatmul.msk.f32.gmra.mxu3 %vm1563_vm14, %v1549_v46 }
 0x638   : > { %v1534_v39 = vpop.f32.mrf.mxu1 }
 0x639   : > { %v1535_v52 = vadd.f32 %v1534_v39, %v1480_v42 }
 0x63b   : > { %v1550_v61 = vmax.f32 %v1535_v52, 0.0 }
 0x63d   : > { %2385 = vmatmul.msk.f32.gmra.mxu3 %vm1563_vm14, %v1550_v61 }
 0x640   : > { %v1537_v60 = vpop.f32.mrf.mxu1 }
 0x641   : > { %v1538_v59 = vadd.f32 %v1537_v60, %v1480_v42 }
 0x643   : > { %v1551_v4 = vmax.f32 %v1538_v59, 0.0 }
 0x645   : > { %2386 = vmatmul.msk.f32.gmra.mxu3 %vm1563_vm14, %v1551_v4 }
 0x648   : > { %v1540_v14 = vpop.f32.mrf.mxu1 }
 0x649   : > { %v1541_v63 = vadd.f32 %v1540_v14, %v1480_v42 }
 0x64b   : > { %v1552_v0 = vmax.f32 %v1541_v63, 0.0 }
 0x64d   : > { %2387 = vmatmul.msk.f32.gmra.mxu3 %vm1563_vm14, %v1552_v0 }
 0x684   : > { %v1543_v45 = vpop.f32.mrf.mxu1 }
 0x685   : > { %v1544_v5 = vadd.f32 %v1543_v45, %v1480_v42 }
 0x687   : > { %v1553_v22 = vmax.f32 %v1544_v5, 0.0 }
 0x689   : > { %v1605_v11 = vpop.f32.mrf.mxu3  ;;  %2388 = vmatmul.msk.f32.gmra.mxu3 %vm1563_vm14, %v1553_v22 }
 0x68a   : > { %v1606_v51 = vadd.f32 %v1605_v11, %v1562_v3 }
 0x68c   : > { %v1629_v53 = vadd.f32 %v1606_v51, %v3194_v29 }
 0x68e   : > { %v1637_v24 = vsel %vm529_vm2, %v1629_v53, 0.0 }
 0x68f   : > { %1638 = vadd.xlane.f32.xlu0 %v1637_v24 }
 0x691   : > { %v1608_v54 = vpop.f32.mrf.mxu3 }
 0x692   : > { %v1609_v15 = vadd.f32 %v1608_v54, %v1562_v3  ;;  %v1834_v54 = vld [vmem:[%s3550_s8 + $0x18] sm:$0xff] }
 0x693   : > { %1872 = vmatpush.msra.mxu2 %v1834_v54 }
 0x694   : > { %v1630_v28 = vadd.f32 %v1609_v15, %v3201_v21  ;;  %v1833_v15 = vld [vmem:[%s3550_s8 + $0x10] sm:$0xff] }
 0x695   : > { %1873 = vmatpush.msra.mxu2 %v1833_v15 }
 0x696   : > { %v1640_v6 = vsel %vm529_vm2, %v1630_v28, 0.0 }
 0x697   : > { %1641 = vadd.xlane.f32.xlu1 %v1640_v6  ;;  %v1831_v6 = vld [vmem:[%s3550_s8] sm:$0xff] }
 0x699   : > { %v1611_v58 = vpop.f32.mrf.mxu3 }
 0x69a   : > { %v1612_v17 = vadd.f32 %v1611_v58, %v1562_v3 }
 0x69c   : > { %v1631_v49 = vadd.f32 %v1612_v17, %v3208_v2 }
 0x69e   : > { %v1643_v25 = vsel %vm529_vm2, %v1631_v49, 0.0 }
 0x69f   : > { %1644 = vadd.xlane.f32.xlu2 %v1643_v25 }
 0x6b8   : > { %v1614_v16 = vpop.f32.mrf.mxu3 }
 0x6b9   : > { %v1615_v18 = vadd.f32 %v1614_v16, %v1562_v3 }
 0x6bb   : > { %v1632_v29 = vadd.f32 %v1615_v18, %v3228_v56 }
 0x6bd   : > { %v1646_v57 = vsel %vm529_vm2, %v1632_v29, 0.0 }
 0x6be   : > { %1647 = vadd.xlane.f32.xlu0 %v1646_v57 }
 0x6c0   : > { %v1617_v8 = vpop.f32.mrf.mxu3 }
 0x6c1   : > { %v1618_v30 = vadd.f32 %v1617_v8, %v1562_v3 }
 0x6c3   : > { %v1633_v21 = vadd.f32 %v1618_v30, %v3235_v1 }
 0x6c5   : > { %v1649_v32 = vsel %vm529_vm2, %v1633_v21, 0.0 }
 0x6c6   : > { %1650 = vadd.xlane.f32.xlu1 %v1649_v32 }
 0x6c8   : > { %v1620_v23 = vpop.f32.mrf.mxu3 }
 0x6c9   : > { %v1621_v26 = vadd.f32 %v1620_v23, %v1562_v3 }
 0x6cb   : > { %v1634_v2 = vadd.f32 %v1621_v26, %v3242_v50 }
 0x6cd   : > { %v1652_v31 = vsel %vm529_vm2, %v1634_v2, 0.0 }
 0x6ce   : > { %1653 = vadd.xlane.f32.xlu2 %v1652_v31 }
 0x6d0   : > { %v1623_v7 = vpop.f32.mrf.mxu3 }
 0x6d1   : > { %v1624_v34 = vadd.f32 %v1623_v7, %v1562_v3 }
 0x6d3   : > { %v1635_v56 = vadd.f32 %v1624_v34, %v3249_v20  ;;  %v3368_v34 = vld [vmem:[%s3553_s11 + $0x8] sm:$0x1f] }
 0x6d5   : > { %v1655_v35 = vsel %vm529_vm2, %v1635_v56, 0.0 }
 0x6d6   : > { %1656 = vadd.xlane.f32.xlu1 %v1655_v35 }
 0x702   : > { %v1639_v27 = vpop.xlane.xlu0 %1638 }
 0x703   : > { %v1661_v1 = vmul.f32 %v1639_v27, %v3110_v10 }
 0x705   : > { %v3301_v36 = vsub.f32 %v1629_v53, %v1661_v1 }
 0x707   : > { %v1677_v42 = vmul.f32 %v3301_v36, %v3301_v36 }
 0x709   : > { %v1685_v50 = vsel %vm529_vm2, %v1677_v42, 0.0 }
 0x70a   : > { %v1642_v47 = vpop.xlane.xlu1 %1641  ;;  %1686 = vadd.xlane.f32.xlu0 %v1685_v50  ;;  %v3371_v50 = vperm.slane %v3368_v34, 0 }
 0x70b   : > { %v1662_v37 = vmul.f32 %v1642_v47, %v3110_v10 }
 0x70c   : > { %v1626_v38 = vpop.f32.mrf.mxu3 }
 0x70d   : > { %v3307_v9 = vsub.f32 %v1630_v28, %v1662_v37  ;;  %v1627_v20 = vadd.f32 %v1626_v38, %v1562_v3  ;;  %v1832_v28 = vld [vmem:[%s3550_s8 + $0x8] sm:$0xff] }
 0x70e   : > { %1874 = vmatpush.msra.mxu2 %v1832_v28 }
 0x70f   : > { %v1678_v13 = vmul.f32 %v3307_v9, %v3307_v9  ;;  %v1636_v43 = vadd.f32 %v1627_v20, %v3273_v40  ;;  %v3375_v20 = vperm.slane %v3368_v34, 1 }
 0x710   : > { %1875 = vmatpush.msra.mxu2 %v1831_v6 }
 0x711   : > { %v1688_v19 = vsel %vm529_vm2, %v1678_v13, 0.0  ;;  %v1658_v12 = vsel %vm529_vm2, %v1636_v43, 0.0 }
 0x712   : > { %1689 = vadd.xlane.f32.xlu2 %v1688_v19  ;;  %1659 = vadd.xlane.f32.xlu0 %v1658_v12  ;;  %v1645_v33 = vpop.xlane.xlu2 %1644 }
 0x713   : > { %v1663_v48 = vmul.f32 %v1645_v33, %v3110_v10 }
 0x715   : > { %v3315_v41 = vsub.f32 %v1631_v49, %v1663_v48 }
 0x717   : > { %v1679_v55 = vmul.f32 %v3315_v41, %v3315_v41 }
 0x719   : > { %v1691_v62 = vsel %vm529_vm2, %v1679_v55, 0.0 }
 0x71a   : > { %1692 = vadd.xlane.f32.xlu1 %v1691_v62 }
 0x731   : > { %v1648_v44 = vpop.xlane.xlu0 %1647 }
 0x732   : > { %v1664_v40 = vmul.f32 %v1648_v44, %v3110_v10 }
 0x734   : > { %v3321_v46 = vsub.f32 %v1632_v29, %v1664_v40 }
 0x736   : > { %v1680_v39 = vmul.f32 %v3321_v46, %v3321_v46 }
 0x738   : > { %v1694_v52 = vsel %vm529_vm2, %v1680_v39, 0.0 }
 0x739   : > { %1695 = vadd.xlane.f32.xlu2 %v1694_v52  ;;  %v1651_v61 = vpop.xlane.xlu1 %1650 }
 0x73a   : > { %v1665_v60 = vmul.f32 %v1651_v61, %v3110_v10 }
 0x73c   : > { %v3327_v59 = vsub.f32 %v1633_v21, %v1665_v60 }
 0x73e   : > { %v1681_v4 = vmul.f32 %v3327_v59, %v3327_v59 }
 0x740   : > { %v1697_v14 = vsel %vm529_vm2, %v1681_v4, 0.0 }
 0x741   : > { %1698 = vadd.xlane.f32.xlu0 %v1697_v14  ;;  %v1654_v63 = vpop.xlane.xlu2 %1653 }
 0x742   : > { %v1666_v0 = vmul.f32 %v1654_v63, %v3110_v10 }
 0x744   : > { %v3333_v45 = vsub.f32 %v1634_v2, %v1666_v0 }
 0x746   : > { %v1682_v5 = vmul.f32 %v3333_v45, %v3333_v45 }
 0x748   : > { %v1700_v3 = vsel %vm529_vm2, %v1682_v5, 0.0 }
 0x749   : > { %v1657_v22 = vpop.xlane.xlu1 %1656  ;;  %1701 = vadd.xlane.f32.xlu1 %v1700_v3 }
 0x74a   : > { %v1667_v11 = vmul.f32 %v1657_v22, %v3110_v10 }
 0x74c   : > { %v3339_v51 = vsub.f32 %v1635_v56, %v1667_v11 }
 0x74e   : > { %v1683_v53 = vmul.f32 %v3339_v51, %v3339_v51 }
 0x750   : > { %v1703_v24 = vsel %vm529_vm2, %v1683_v53, 0.0 }
 0x751   : > { %1704 = vadd.xlane.f32.xlu2 %v1703_v24 }
 0x77d   : > { %v1687_v58 = vpop.xlane.xlu0 %1686 }
 0x77e   : > { %v1709_v17 = vmul.f32 %v1687_v58, %v3110_v10 }
 0x780   : > { %v1717_v49 = vadd.f32 1e-05, %v1709_v17 }
 0x782   : > { %2541 = vrsqrt.f32 %v1717_v49  ;;  %vm1731_vm0 = vweird.f32 %v1717_v49 }
 0x785   : > { %v1660_v25 = vpop.xlane.xlu0 %1659  ;;  %v1690_v16 = vpop.xlane.xlu2 %1689 }
 0x786   : > { %v1668_v18 = vmul.f32 %v1660_v25, %v3110_v10  ;;  %v1710_v29 = vmul.f32 %v1690_v16, %v3110_v10 }
 0x788   : > { %v2542_v57 = vpop.eup %2541  ;;  %v3359_v8 = vsub.f32 %v1636_v43, %v1668_v18  ;;  %v1718_v30 = vadd.f32 1e-05, %v1710_v29 }
 0x789   : > { %v1726_v21 = vmul.f32 %v2542_v57, %v1717_v49  ;;  %vm1732_vm15 = vweird.f32 %v2542_v57 }
 0x78a   : > { %2543 = vrsqrt.f32 %v1718_v30  ;;  %v1684_v32 = vmul.f32 %v3359_v8, %v3359_v8  ;;  %vm1733_vm1 = vmor %vm1731_vm0, %vm1732_vm15  ;;  %vm1741_vm4 = vweird.f32 %v1718_v30 }
 0x78b   : > { %v1727_v23 = vmul.f32 %v2542_v57, %v1726_v21 }
 0x78c   : > { %v1706_v26 = vsel %vm529_vm2, %v1684_v32, 0.0 }
 0x78d   : > { %v1728_v2 = vmul.f32 0.5, %v1727_v23  ;;  %1707 = vadd.xlane.f32.xlu0 %v1706_v26  ;;  %v1693_v31 = vpop.xlane.xlu1 %1692 }
 0x78e   : > { %v1711_v7 = vmul.f32 %v1693_v31, %v3110_v10 }
 0x78f   : > { %v1729_v56 = vsub.f32 1.5, %v1728_v2 }
 0x790   : > { %v2544_v35 = vpop.eup %2543  ;;  %v1719_v27 = vadd.f32 1e-05, %v1711_v7 }
 0x791   : > { %v1730_v1 = vmul.f32 %v2542_v57, %v1729_v56  ;;  %v1736_v42 = vmul.f32 %v2544_v35, %v1718_v30  ;;  %vm1742_vm3 = vweird.f32 %v2544_v35 }
 0x792   : > { %2545 = vrsqrt.f32 %v1719_v27  ;;  %vm1743_vm5 = vmor %vm1741_vm4, %vm1742_vm3  ;;  %vm1751_vm7 = vweird.f32 %v1719_v27 }
 0x793   : > { %v1734_v47 = vsel %vm1733_vm1, %v2542_v57, %v1730_v1  ;;  %v1737_v37 = vmul.f32 %v2544_v35, %v1736_v42 }
 0x794   : > { %v1805_v38 = vmul.f32 %v1734_v47, %v3301_v36 }
 0x795   : > { %v1738_v13 = vmul.f32 0.5, %v1737_v37 }
 0x796   : > { %v1814_v43 = vmul.f32 %v3371_v50, %v1805_v38 }
 0x797   : > { %v1739_v19 = vsub.f32 1.5, %v1738_v13 }
 0x798   : > { %v2546_v12 = vpop.eup %2545  ;;  %v1823_v33 = vadd.f32 %v3375_v20, %v1814_v43 }
 0x799   : > { %v1740_v48 = vmul.f32 %v2544_v35, %v1739_v19  ;;  %v1746_v55 = vmul.f32 %v2546_v12, %v1719_v27  ;;  %vm1752_vm6 = vweird.f32 %v2546_v12 }
 0x79a   : > { %2389 = vmatmul.msk.f32.vlgmr.msra.gmra.mxu2 %vm529_vm2, %v1823_v33  ;;  %vm1753_vm8 = vmor %vm1751_vm7, %vm1752_vm6 }
 0x79b   : > { %v1744_v62 = vsel %vm1743_vm5, %v2544_v35, %v1740_v48  ;;  %v1747_v44 = vmul.f32 %v2546_v12, %v1746_v55 }
 0x79c   : > { %v1806_v36 = vmul.f32 %v1744_v62, %v3307_v9 }
 0x79d   : > { %v1748_v40 = vmul.f32 0.5, %v1747_v44 }
 0x79e   : > { %v1815_v39 = vmul.f32 %v3371_v50, %v1806_v36 }
 0x79f   : > { %v1749_v52 = vsub.f32 1.5, %v1748_v40 }
 0x7a0   : > { %v1824_v61 = vadd.f32 %v3375_v20, %v1815_v39 }
 0x7a1   : > { %v1750_v60 = vmul.f32 %v2546_v12, %v1749_v52 }
 0x7a2   : > { %2390 = vmatmul.msk.f32.gmra.mxu2 %vm529_vm2, %v1824_v61 }
 0x7a3   : > { %v1754_v4 = vsel %vm1753_vm8, %v2546_v12, %v1750_v60  ;;  %v1915_v60 = vld [vmem:[%s3551_s9 + $0x30] sm:$0xff] }
 0x7a4   : > { %v1807_v14 = vmul.f32 %v1754_v4, %v3315_v41  ;;  %v1913_v4 = vld [vmem:[%s3551_s9 + $0x20] sm:$0xff] }
 0x7a6   : > { %v1816_v63 = vmul.f32 %v3371_v50, %v1807_v14  ;;  %v1912_v14 = vld [vmem:[%s3551_s9 + $0x18] sm:$0xff] }
 0x7a8   : > { %v1825_v0 = vadd.f32 %v3375_v20, %v1816_v63  ;;  %v1911_v63 = vld [vmem:[%s3551_s9 + $0x10] sm:$0xff] }
 0x7aa   : > { %2391 = vmatmul.msk.f32.gmra.mxu2 %vm529_vm2, %v1825_v0  ;;  %v1910_v0 = vld [vmem:[%s3551_s9 + $0x8] sm:$0xff] }
 0x7ac   : > { %v1696_v9 = vpop.xlane.xlu2 %1695 }
 0x7ad   : > { %v1712_v5 = vmul.f32 %v1696_v9, %v3110_v10 }
 0x7af   : > { %v1720_v3 = vadd.f32 1e-05, %v1712_v5  ;;  %v1909_v5 = vld [vmem:[%s3551_s9] sm:$0xff] }
 0x7b1   : > { %2547 = vrsqrt.f32 %v1720_v3  ;;  %vm1761_vm10 = vweird.f32 %v1720_v3 }
 0x7b4   : > { %v1699_v22 = vpop.xlane.xlu0 %1698 }
 0x7b5   : > { %v1713_v11 = vmul.f32 %v1699_v22, %v3110_v10 }
 0x7b7   : > { %v2548_v53 = vpop.eup %2547  ;;  %v1721_v24 = vadd.f32 1e-05, %v1713_v11 }
 0x7b8   : > { %v1756_v54 = vmul.f32 %v2548_v53, %v1720_v3  ;;  %vm1762_vm9 = vweird.f32 %v2548_v53 }
 0x7b9   : > { %2549 = vrsqrt.f32 %v1721_v24  ;;  %vm1763_vm11 = vmor %vm1761_vm10, %vm1762_vm9  ;;  %vm1771_vm13 = vweird.f32 %v1721_v24 }
 0x7ba   : > { %v1757_v15 = vmul.f32 %v2548_v53, %v1756_v54 }
 0x7bc   : > { %v1758_v41 = vmul.f32 0.5, %v1757_v15  ;;  %v1702_v28 = vpop.xlane.xlu1 %1701 }
 0x7bd   : > { %v1714_v6 = vmul.f32 %v1702_v28, %v3110_v10 }
 0x7be   : > { %v1759_v58 = vsub.f32 1.5, %v1758_v41 }
 0x7bf   : > { %v2550_v17 = vpop.eup %2549  ;;  %v1722_v49 = vadd.f32 1e-05, %v1714_v6 }
 0x7c0   : > { %v1760_v25 = vmul.f32 %v2548_v53, %v1759_v58  ;;  %v1766_v16 = vmul.f32 %v2550_v17, %v1721_v24  ;;  %vm1772_vm12 = vweird.f32 %v2550_v17 }
 0x7c1   : > { %2551 = vrsqrt.f32 %v1722_v49  ;;  %vm1773_vm15 = vmor %vm1771_vm13, %vm1772_vm12  ;;  %vm1781_vm1 = vweird.f32 %v1722_v49  ;;  %vm2228_vm13 = vcmask 48128  }
 0x7c2   : > { %v1764_v18 = vsel %vm1763_vm11, %v2548_v53, %v1760_v25  ;;  %v1767_v29 = vmul.f32 %v2550_v17, %v1766_v16 }
 0x7c3   : > { %v1808_v57 = vmul.f32 %v1764_v18, %v3321_v46 }
 0x7c4   : > { %v1768_v30 = vmul.f32 0.5, %v1767_v29  ;;  %v1705_v21 = vpop.xlane.xlu2 %1704 }
 0x7c5   : > { %v1715_v32 = vmul.f32 %v1705_v21, %v3110_v10  ;;  %v1817_v23 = vmul.f32 %v3371_v50, %v1808_v57 }
 0x7c6   : > { %v1769_v26 = vsub.f32 1.5, %v1768_v30 }
 0x7c7   : > { %v2552_v2 = vpop.eup %2551  ;;  %v1723_v31 = vadd.f32 1e-05, %v1715_v32  ;;  %v1826_v7 = vadd.f32 %v3375_v20, %v1817_v23  ;;  %v1996_v32 = vld [vmem:[%s3552_s10 + $0x28] sm:$0xff] }
 0x7c8   : > { %v1770_v56 = vmul.f32 %v2550_v17, %v1769_v26  ;;  %v1776_v35 = vmul.f32 %v2552_v2, %v1722_v49  ;;  %vm1782_vm0 = vweird.f32 %v2552_v2 }
 0x7c9   : > { %2553 = vrsqrt.f32 %v1723_v31  ;;  %2392 = vmatmul.msk.f32.gmra.mxu2 %vm529_vm2, %v1826_v7  ;;  %vm1783_vm3 = vmor %vm1781_vm1, %vm1782_vm0  ;;  %vm1791_vm5 = vweird.f32 %v1723_v31  ;;  %v1994_v7 = vld [vmem:[%s3552_s10 + $0x18] sm:$0xff] }
 0x7ca   : > { %v1774_v46 = vsel %vm1773_vm15, %v2550_v17, %v1770_v56  ;;  %v1777_v27 = vmul.f32 %v2552_v2, %v1776_v35  ;;  %v1835_v17 = vperm.slane %v3368_v34, 2 }
 0x7cb   : > { %v1809_v1 = vmul.f32 %v1774_v46, %v3327_v59 }
 0x7cc   : > { %v1778_v42 = vmul.f32 0.5, %v1777_v27 }
 0x7cd   : > { %v1818_v47 = vmul.f32 %v3371_v50, %v1809_v1 }
 0x7ce   : > { %v1779_v37 = vsub.f32 1.5, %v1778_v42 }
 0x7cf   : > { %v2554_v38 = vpop.eup %2553  ;;  %v1827_v13 = vadd.f32 %v3375_v20, %v1818_v47 }
 0x7d0   : > { %v1780_v43 = vmul.f32 %v2552_v2, %v1779_v37  ;;  %v1786_v19 = vmul.f32 %v2554_v38, %v1723_v31  ;;  %vm1792_vm4 = vweird.f32 %v2554_v38 }
 0x7d1   : > { %2393 = vmatmul.msk.f32.gmra.mxu2 %vm529_vm2, %v1827_v13  ;;  %vm1793_vm6 = vmor %vm1791_vm5, %vm1792_vm4  ;;  %v1993_v13 = vld [vmem:[%s3552_s10 + $0x10] sm:$0xff] }
 0x7d2   : > { %v1784_v12 = vsel %vm1783_vm3, %v2552_v2, %v1780_v43  ;;  %v1787_v33 = vmul.f32 %v2554_v38, %v1786_v19  ;;  %v1995_v2 = vld [vmem:[%s3552_s10 + $0x20] sm:$0xff]  ;;  %v1992_v43 = vld [vmem:[%s3552_s10 + $0x8] sm:$0xff] }
 0x7d3   : > { %v1810_v48 = vmul.f32 %v1784_v12, %v3333_v45  ;;  %v1916_v45 = vld [vmem:[%s3551_s9 + $0x38] sm:$0xff]  ;;  %v1991_v19 = vld [vmem:[%s3552_s10] sm:$0xff]  ;;  %v1917_v12 = vperm.slane %v3368_v34, 3 }
 0x7d4   : > { %v1788_v55 = vmul.f32 0.5, %v1787_v33  ;;  %1950 = vmatpush.msrb.mxu0 %v1916_v45 }
 0x7d5   : > { %v1819_v59 = vmul.f32 %v3371_v50, %v1810_v48 }
 0x7d6   : > { %v1789_v62 = vsub.f32 1.5, %v1788_v55  ;;  %1951 = vmatpush.msrb.mxu0 %v1915_v60 }
 0x7d7   : > { %v1828_v44 = vadd.f32 %v3375_v20, %v1819_v59 }
 0x7d8   : > { %v1790_v36 = vmul.f32 %v2554_v38, %v1789_v62 }
 0x7d9   : > { %2394 = vmatmul.msk.f32.gmra.mxu2 %vm529_vm2, %v1828_v44 }
 0x7da   : > { %v1794_v40 = vsel %vm1793_vm6, %v2554_v38, %v1790_v36 }
 0x7db   : > { %v1811_v39 = vmul.f32 %v1794_v40, %v3339_v51  ;;  %v1914_v51 = vld [vmem:[%s3551_s9 + $0x28] sm:$0xff] }
 0x7dc   : > { %1952 = vmatpush.msrb.mxu0 %v1914_v51 }
 0x7dd   : > { %v1820_v52 = vmul.f32 %v3371_v50, %v1811_v39 }
 0x7de   : > { %1953 = vmatpush.msrb.mxu0 %v1913_v4 }
 0x7df   : > { %v1829_v61 = vadd.f32 %v3375_v20, %v1820_v52 }
 0x7e0   : > { %1954 = vmatpush.msrb.mxu0 %v1912_v14 }
 0x7e1   : > { %2395 = vmatmul.msk.f32.gmra.mxu2 %vm529_vm2, %v1829_v61 }
 0x7e2   : > { %1955 = vmatpush.msrb.mxu0 %v1911_v63 }
 0x7e4   : > { %1956 = vmatpush.msrb.mxu0 %v1910_v0 }
 0x7e6   : > { %1957 = vmatpush.msrb.mxu0 %v1909_v5 }
 0x800   : > { %v1708_v9 = vpop.xlane.xlu0 %1707 }
 0x801   : > { %v1716_v3 = vmul.f32 %v1708_v9, %v3110_v10 }
 0x803   : > { %v1724_v22 = vadd.f32 1e-05, %v1716_v3 }
 0x805   : > { %2555 = vrsqrt.f32 %v1724_v22  ;;  %vm1801_vm8 = vweird.f32 %v1724_v22 }
 0x80b   : > { %v2556_v11 = vpop.eup %2555 }
 0x80c   : > { %v1796_v53 = vmul.f32 %v2556_v11, %v1724_v22  ;;  %vm1802_vm7 = vweird.f32 %v2556_v11 }
 0x80d   : > { %vm1803_vm9 = vmor %vm1801_vm8, %vm1802_vm7 }
 0x80e   : > { %v1797_v24 = vmul.f32 %v2556_v11, %v1796_v53 }
 0x810   : > { %v1798_v54 = vmul.f32 0.5, %v1797_v24  ;;  %v3479_v24 = vperm.slane %v3368_v34, 4 }
 0x812   : > { %v1799_v15 = vsub.f32 1.5, %v1798_v54 }
 0x814   : > { %v1800_v41 = vmul.f32 %v2556_v11, %v1799_v15 }
 0x816   : > { %v1804_v28 = vsel %vm1803_vm9, %v2556_v11, %v1800_v41 }
 0x817   : > { %v1812_v6 = vmul.f32 %v1804_v28, %v3359_v8 }
 0x819   : > { %v1821_v58 = vmul.f32 %v3371_v50, %v1812_v6  ;;  %v1998_v50 = vld [vmem:[%s3552_s10 + $0x38] sm:$0xff] }
 0x81a   : > { %2032 = vmatpush.msrb.mxu1 %v1998_v50 }
 0x81b   : > { %v1830_v10 = vadd.f32 %v3375_v20, %v1821_v58  ;;  %v1997_v20 = vld [vmem:[%s3552_s10 + $0x30] sm:$0xff] }
 0x81c   : > { %2033 = vmatpush.msrb.mxu1 %v1997_v20 }
 0x81d   : > { %v1877_v49 = vpop.f32.mrf.mxu2  ;;  %2396 = vmatmul.msk.f32.gmra.mxu2 %vm529_vm2, %v1830_v10 }
 0x81e   : > { %v1878_v25 = vadd.f32 %v1877_v49, %v1835_v17  ;;  %2034 = vmatpush.msrb.mxu1 %v1996_v32 }
 0x820   : > { %v1901_v16 = vmax.f32 %v1878_v25, 0.0  ;;  %2035 = vmatpush.msrb.mxu1 %v1995_v2 }
 0x822   : > { %2397 = vmatmul.msk.f32.vlgmr.msrb.gmra.mxu0 %vm1563_vm14, %v1901_v16  ;;  %2036 = vmatpush.msrb.mxu1 %v1994_v7 }
 0x824   : > { %2037 = vmatpush.msrb.mxu1 %v1993_v13 }
 0x825   : > { %v1880_v18 = vpop.f32.mrf.mxu2 }
 0x826   : > { %v1881_v29 = vadd.f32 %v1880_v18, %v1835_v17  ;;  %2038 = vmatpush.msrb.mxu1 %v1992_v43 }
 0x828   : > { %v1902_v57 = vmax.f32 %v1881_v29, 0.0  ;;  %2039 = vmatpush.msrb.mxu1 %v1991_v19 }
 0x82a   : > { %2398 = vmatmul.msk.f32.gmra.mxu0 %vm1563_vm14, %v1902_v57 }
 0x82d   : > { %v1883_v30 = vpop.f32.mrf.mxu2 }
 0x82e   : > { %v1884_v8 = vadd.f32 %v1883_v30, %v1835_v17 }
 0x830   : > { %v1903_v21 = vmax.f32 %v1884_v8, 0.0  ;;  %v2065_v8 = vlaneseq }
 0x832   : > { %2399 = vmatmul.msk.f32.gmra.mxu0 %vm1563_vm14, %v1903_v21  ;;  %v3485_v32 = vand.u32 127, %v2065_v8 }
 0x834   : > { %vm2067_vm10 = vcmp.lt.s32.totalorder %v3485_v32, 2 }
 0x84c   : > { %v1886_v23 = vpop.f32.mrf.mxu2 }
 0x84d   : > { %v1887_v26 = vadd.f32 %v1886_v23, %v1835_v17 }
 0x84f   : > { %v1904_v31 = vmax.f32 %v1887_v26, 0.0 }
 0x851   : > { %2400 = vmatmul.msk.f32.gmra.mxu0 %vm1563_vm14, %v1904_v31 }
 0x854   : > { %v1889_v56 = vpop.f32.mrf.mxu2 }
 0x855   : > { %v1890_v35 = vadd.f32 %v1889_v56, %v1835_v17 }
 0x857   : > { %v1905_v46 = vmax.f32 %v1890_v35, 0.0 }
 0x859   : > { %2401 = vmatmul.msk.f32.gmra.mxu0 %vm1563_vm14, %v1905_v46 }
 0x85c   : > { %v1892_v27 = vpop.f32.mrf.mxu2 }
 0x85d   : > { %v1893_v1 = vadd.f32 %v1892_v27, %v1835_v17 }
 0x85f   : > { %v1906_v42 = vmax.f32 %v1893_v1, 0.0 }
 0x861   : > { %2402 = vmatmul.msk.f32.gmra.mxu0 %vm1563_vm14, %v1906_v42 }
 0x864   : > { %v1895_v47 = vpop.f32.mrf.mxu2 }
 0x865   : > { %v1896_v37 = vadd.f32 %v1895_v47, %v1835_v17 }
 0x867   : > { %v1907_v38 = vmax.f32 %v1896_v37, 0.0 }
 0x869   : > { %2403 = vmatmul.msk.f32.gmra.mxu0 %vm1563_vm14, %v1907_v38 }
 0x89f   : > { %v1959_v33 = vpop.f32.mrf.mxu0 }
 0x8a0   : > { %v1960_v48 = vadd.f32 %v1959_v33, %v1917_v12  ;;  %v1898_v55 = vpop.f32.mrf.mxu2 }
 0x8a1   : > { %v1899_v59 = vadd.f32 %v1898_v55, %v1835_v17 }
 0x8a2   : > { %v1983_v62 = vmax.f32 %v1960_v48, 0.0 }
 0x8a3   : > { %v1908_v44 = vmax.f32 %v1899_v59, 0.0 }
 0x8a4   : > { %2405 = vmatmul.msk.f32.vlgmr.msrb.gmra.mxu1 %vm1563_vm14, %v1983_v62 }
 0x8a5   : > { %2404 = vmatmul.msk.f32.gmra.mxu0 %vm1563_vm14, %v1908_v44 }
 0x8a7   : > { %v1962_v36 = vpop.f32.mrf.mxu0 }
 0x8a8   : > { %v1963_v40 = vadd.f32 %v1962_v36, %v1917_v12 }
 0x8aa   : > { %v1984_v39 = vmax.f32 %v1963_v40, 0.0 }
 0x8ac   : > { %2406 = vmatmul.msk.f32.gmra.mxu1 %vm1563_vm14, %v1984_v39 }
 0x8af   : > { %v1965_v52 = vpop.f32.mrf.mxu0 }
 0x8b0   : > { %v1966_v61 = vadd.f32 %v1965_v52, %v1917_v12 }
 0x8b2   : > { %v1985_v45 = vmax.f32 %v1966_v61, 0.0 }
 0x8b4   : > { %2407 = vmatmul.msk.f32.gmra.mxu1 %vm1563_vm14, %v1985_v45 }
 0x8ce   : > { %v1968_v60 = vpop.f32.mrf.mxu0 }
 0x8cf   : > { %v1969_v51 = vadd.f32 %v1968_v60, %v1917_v12 }
 0x8d1   : > { %v1986_v4 = vmax.f32 %v1969_v51, 0.0 }
 0x8d3   : > { %2408 = vmatmul.msk.f32.gmra.mxu1 %vm1563_vm14, %v1986_v4 }
 0x8d6   : > { %v1971_v14 = vpop.f32.mrf.mxu0 }
 0x8d7   : > { %v1972_v63 = vadd.f32 %v1971_v14, %v1917_v12 }
 0x8d9   : > { %v1987_v0 = vmax.f32 %v1972_v63, 0.0 }
 0x8db   : > { %2409 = vmatmul.msk.f32.gmra.mxu1 %vm1563_vm14, %v1987_v0 }
 0x8de   : > { %v1974_v9 = vpop.f32.mrf.mxu0 }
 0x8df   : > { %v1975_v5 = vadd.f32 %v1974_v9, %v1917_v12 }
 0x8e1   : > { %v1988_v3 = vmax.f32 %v1975_v5, 0.0 }
 0x8e3   : > { %2410 = vmatmul.msk.f32.gmra.mxu1 %vm1563_vm14, %v1988_v3 }
 0x8e6   : > { %v1977_v22 = vpop.f32.mrf.mxu0 }
 0x8e7   : > { %v1978_v11 = vadd.f32 %v1977_v22, %v1917_v12 }
 0x8e9   : > { %v1989_v53 = vmax.f32 %v1978_v11, 0.0 }
 0x8eb   : > { %2411 = vmatmul.msk.f32.gmra.mxu1 %vm1563_vm14, %v1989_v53 }
 0x921   : > { %v2041_v54 = vpop.f32.mrf.mxu1 }
 0x922   : > { %v2042_v15 = vadd.f32 %v2041_v54, %v3479_v24  ;;  %v1980_v41 = vpop.f32.mrf.mxu0 }
 0x923   : > { %v1981_v28 = vadd.f32 %v1980_v41, %v1917_v12 }
 0x924   : > { %v2413_v6 = vmul.f32 -1.442695, %v2042_v15 }
 0x925   : > { %v1990_v58 = vmax.f32 %v1981_v28, 0.0 }
 0x926   : > { %2557 = vpow2.f32 %v2413_v6 }
 0x927   : > { %2412 = vmatmul.msk.f32.gmra.mxu1 %vm1563_vm14, %v1990_v58 }
 0x929   : > { %v2044_v17 = vpop.f32.mrf.mxu1 }
 0x92a   : > { %v2045_v10 = vadd.f32 %v2044_v17, %v3479_v24 }
 0x92c   : > { %v2558_v49 = vpop.eup %2557  ;;  %v2414_v25 = vmul.f32 -1.442695, %v2045_v10 }
 0x92d   : > { %v2092_v16 = vadd.f32 1.0, %v2558_v49 }
 0x92e   : > { %2559 = vpow2.f32 %v2414_v25 }
 0x92f   : > { %2561 = vrcp.f32 %v2092_v16  ;;  %v2111_v23 = vand.u32 2147483648, %v2092_v16  ;;  %v2109_v2 = vand.u32 2147483647, %v2092_v16  ;;  %vm2105_vm14 = vweird.f32 %v2092_v16 }
 0x931   : > { %v2047_v34 = vpop.f32.mrf.mxu1  ;;  %v2112_v35 = vor.u32 1.1754944e-38, %v2111_v23  ;;  %vm2110_vm12 = vcmp.eq.f32.partialorder %v2109_v2, 8.507059e+37 }
 0x932   : > { %v2048_v18 = vadd.f32 %v2047_v34, %v3479_v24 }
 0x934   : > { %v2560_v29 = vpop.eup %2559  ;;  %v2415_v57 = vmul.f32 -1.442695, %v2048_v18 }
 0x935   : > { %v2562_v30 = vpop.eup %2561  ;;  %v2093_v21 = vadd.f32 1.0, %v2560_v29 }
 0x936   : > { %v2101_v50 = vmul.f32 %v2562_v30, %v2092_v16  ;;  %2563 = vpow2.f32 %v2415_v57  ;;  %vm2106_vm2 = vweird.f32 %v2562_v30 }
 0x937   : > { %2565 = vrcp.f32 %v2093_v21  ;;  %vm2107_vm11 = vmor %vm2105_vm14, %vm2106_vm2  ;;  %v2126_v38 = vand.u32 2147483648, %v2093_v21  ;;  %v2124_v43 = vand.u32 2147483647, %v2093_v21  ;;  %vm2120_vm0 = vweird.f32 %v2093_v21 }
 0x938   : > { %v2102_v20 = vsub.f32 1.0, %v2101_v50 }
 0x939   : > { %v2127_v33 = vor.u32 1.1754944e-38, %v2126_v38  ;;  %vm2125_vm3 = vcmp.eq.f32.partialorder %v2124_v43, 8.507059e+37 }
 0x93a   : > { %v2103_v26 = vmul.f32 %v2562_v30, %v2102_v20 }
 0x93c   : > { %v2564_v31 = vpop.eup %2563  ;;  %v2104_v7 = vadd.f32 %v2562_v30, %v2103_v26 }
 0x93d   : > { %v2566_v56 = vpop.eup %2565  ;;  %v2094_v46 = vadd.f32 1.0, %v2564_v31 }
 0x93e   : > { %v2108_v27 = vsel %vm2107_vm11, %v2562_v30, %v2104_v7  ;;  %v2116_v1 = vmul.f32 %v2566_v56, %v2093_v21  ;;  %vm2121_vm15 = vweird.f32 %v2566_v56 }
 0x93f   : > { %v2113_v42 = vsel %vm2110_vm12, %v2112_v35, %v2108_v27  ;;  %2567 = vrcp.f32 %v2094_v46  ;;  %vm2122_vm1 = vmor %vm2120_vm0, %vm2121_vm15  ;;  %v2141_v36 = vand.u32 2147483648, %v2094_v46  ;;  %v2139_v39 = vand.u32 2147483647, %v2094_v46 }
 0x940   : > { %v2220_v47 = vsel %vm2067_vm10, %v2042_v15, %v2113_v42  ;;  %v2117_v37 = vsub.f32 1.0, %v2116_v1  ;;  %vm2135_vm5 = vweird.f32 %v2094_v46 }
 0x941   : > { %2229 = vst.msk [vmem:[%s3492_s25] sm:$0xff] %vm2228_vm13, %v2220_v47  ;;  %v2142_v61 = vor.u32 1.1754944e-38, %v2141_v36  ;;  %vm2140_vm7 = vcmp.eq.f32.partialorder %v2139_v39, 8.507059e+37 }
 0x942   : > { %v2118_v13 = vmul.f32 %v2566_v56, %v2117_v37 }
 0x944   : > { %v2119_v19 = vadd.f32 %v2566_v56, %v2118_v13 }
 0x945   : > { %v2568_v12 = vpop.eup %2567 }
 0x946   : > { %v2123_v48 = vsel %vm2122_vm1, %v2566_v56, %v2119_v19  ;;  %v2131_v55 = vmul.f32 %v2568_v12, %v2094_v46  ;;  %vm2136_vm4 = vweird.f32 %v2568_v12 }
 0x947   : > { %v2128_v59 = vsel %vm2125_vm3, %v2127_v33, %v2123_v48  ;;  %vm2137_vm6 = vmor %vm2135_vm5, %vm2136_vm4 }
 0x948   : > { %v2221_v62 = vsel %vm2067_vm10, %v2045_v10, %v2128_v59  ;;  %v2132_v44 = vsub.f32 1.0, %v2131_v55 }
 0x949   : > { %2230 = vst.msk [vmem:[%s3492_s25 + $0x8] sm:$0xff] %vm2228_vm13, %v2221_v62 }
 0x94a   : > { %v2133_v40 = vmul.f32 %v2568_v12, %v2132_v44 }
 0x94c   : > { %v2134_v52 = vadd.f32 %v2568_v12, %v2133_v40 }
 0x94e   : > { %v2138_v45 = vsel %vm2137_vm6, %v2568_v12, %v2134_v52 }
 0x94f   : > { %v2143_v60 = vsel %vm2140_vm7, %v2142_v61, %v2138_v45 }
 0x950   : > { %v2222_v51 = vsel %vm2067_vm10, %v2048_v18, %v2143_v60  ;;  %v2050_v4 = vpop.f32.mrf.mxu1 }
 0x951   : > { %2231 = vst.msk [vmem:[%s3492_s25 + $0x10] sm:$0xff] %vm2228_vm13, %v2222_v51  ;;  %v2051_v14 = vadd.f32 %v2050_v4, %v3479_v24 }
 0x953   : > { %v2416_v63 = vmul.f32 -1.442695, %v2051_v14 }
 0x955   : > { %2569 = vpow2.f32 %v2416_v63 }
 0x958   : > { %v2053_v0 = vpop.f32.mrf.mxu1 }
 0x959   : > { %v2054_v9 = vadd.f32 %v2053_v0, %v3479_v24 }
 0x95b   : > { %v2570_v5 = vpop.eup %2569  ;;  %v2417_v3 = vmul.f32 -1.442695, %v2054_v9 }
 0x95c   : > { %v2095_v22 = vadd.f32 1.0, %v2570_v5 }
 0x95d   : > { %2571 = vpow2.f32 %v2417_v3 }
 0x95e   : > { %2573 = vrcp.f32 %v2095_v22  ;;  %v2156_v17 = vand.u32 2147483648, %v2095_v22  ;;  %v2154_v25 = vand.u32 2147483647, %v2095_v22  ;;  %vm2150_vm9 = vweird.f32 %v2095_v22 }
 0x960   : > { %v2056_v11 = vpop.f32.mrf.mxu1  ;;  %v2157_v30 = vor.u32 1.1754944e-38, %v2156_v17  ;;  %vm2155_vm14 = vcmp.eq.f32.partialorder %v2154_v25, 8.507059e+37 }
 0x961   : > { %v3509_v53 = vadd.f32 %v2056_v11, %v3479_v24 }
 0x963   : > { %v2572_v54 = vpop.eup %2571  ;;  %v2418_v15 = vmul.f32 -1.442695, %v3509_v53 }
 0x964   : > { %v2574_v41 = vpop.eup %2573  ;;  %v2096_v28 = vadd.f32 1.0, %v2572_v54 }
 0x965   : > { %v2146_v6 = vmul.f32 %v2574_v41, %v2095_v22  ;;  %2575 = vpow2.f32 %v2418_v15  ;;  %vm2151_vm8 = vweird.f32 %v2574_v41 }
 0x966   : > { %2577 = vrcp.f32 %v2096_v28  ;;  %vm2152_vm2 = vmor %vm2150_vm9, %vm2151_vm8  ;;  %v2171_v2 = vand.u32 2147483648, %v2096_v28  ;;  %v2169_v7 = vand.u32 2147483647, %v2096_v28  ;;  %vm2165_vm12 = vweird.f32 %v2096_v28 }
 0x967   : > { %v2147_v58 = vsub.f32 1.0, %v2146_v6 }
 0x968   : > { %v2059_v10 = vpop.f32.mrf.mxu1  ;;  %v2172_v27 = vor.u32 1.1754944e-38, %v2171_v2  ;;  %vm2170_vm0 = vcmp.eq.f32.partialorder %v2169_v7, 8.507059e+37 }
 0x969   : > { %v2148_v49 = vmul.f32 %v2574_v41, %v2147_v58  ;;  %v3513_v16 = vadd.f32 %v2059_v10, %v3479_v24 }
 0x96b   : > { %v2576_v34 = vpop.eup %2575  ;;  %v2149_v18 = vadd.f32 %v2574_v41, %v2148_v49  ;;  %v2419_v29 = vmul.f32 -1.442695, %v3513_v16 }
 0x96c   : > { %v2578_v57 = vpop.eup %2577  ;;  %v2097_v8 = vadd.f32 1.0, %v2576_v34 }
 0x96d   : > { %v2153_v21 = vsel %vm2152_vm2, %v2574_v41, %v2149_v18  ;;  %v2161_v50 = vmul.f32 %v2578_v57, %v2096_v28  ;;  %2579 = vpow2.f32 %v2419_v29  ;;  %vm2166_vm11 = vweird.f32 %v2578_v57 }
 0x96e   : > { %v2158_v20 = vsel %vm2155_vm14, %v2157_v30, %v2153_v21  ;;  %2581 = vrcp.f32 %v2097_v8  ;;  %vm2167_vm15 = vmor %vm2165_vm12, %vm2166_vm11  ;;  %v2186_v43 = vand.u32 2147483648, %v2097_v8  ;;  %v2184_v12 = vand.u32 2147483647, %v2097_v8 }
 0x96f   : > { %v2223_v23 = vsel %vm2067_vm10, %v2051_v14, %v2158_v20  ;;  %v2162_v26 = vsub.f32 1.0, %v2161_v50  ;;  %vm2180_vm3 = vweird.f32 %v2097_v8 }
 0x970   : > { %2232 = vst.msk [vmem:[%s3492_s25 + $0x18] sm:$0xff] %vm2228_vm13, %v2223_v23  ;;  %v2187_v55 = vor.u32 1.1754944e-38, %v2186_v43  ;;  %vm2185_vm5 = vcmp.eq.f32.partialorder %v2184_v12, 8.507059e+37 }
 0x971   : > { %v2163_v31 = vmul.f32 %v2578_v57, %v2162_v26 }
 0x973   : > { %v2580_v56 = vpop.eup %2579  ;;  %v2164_v35 = vadd.f32 %v2578_v57, %v2163_v31 }
 0x974   : > { %v2582_v46 = vpop.eup %2581  ;;  %v2098_v1 = vadd.f32 1.0, %v2580_v56 }
 0x975   : > { %v2168_v42 = vsel %vm2167_vm15, %v2578_v57, %v2164_v35  ;;  %v2176_v47 = vmul.f32 %v2582_v46, %v2097_v8  ;;  %vm2181_vm1 = vweird.f32 %v2582_v46 }
 0x976   : > { %v2173_v37 = vsel %vm2170_vm0, %v2172_v27, %v2168_v42  ;;  %2583 = vrcp.f32 %v2098_v1  ;;  %vm2182_vm4 = vmor %vm2180_vm3, %vm2181_vm1  ;;  %v2201_v39 = vand.u32 2147483648, %v2098_v1  ;;  %v2199_v61 = vand.u32 2147483647, %v2098_v1 }
 0x977   : > { %v2224_v38 = vsel %vm2067_vm10, %v2054_v9, %v2173_v37  ;;  %v2177_v13 = vsub.f32 1.0, %v2176_v47  ;;  %vm2195_vm7 = vweird.f32 %v2098_v1 }
 0x978   : > { %2233 = vst.msk [vmem:[%s3492_s25 + $0x20] sm:$0xff] %vm2228_vm13, %v2224_v38  ;;  %v2202_v60 = vor.u32 1.1754944e-38, %v2201_v39  ;;  %vm2200_vm9 = vcmp.eq.f32.partialorder %v2199_v61, 8.507059e+37 }
 0x979   : > { %v2178_v19 = vmul.f32 %v2582_v46, %v2177_v13 }
 0x97b   : > { %v2179_v33 = vadd.f32 %v2582_v46, %v2178_v19 }
 0x97c   : > { %v2584_v48 = vpop.eup %2583 }
 0x97d   : > { %v2183_v59 = vsel %vm2182_vm4, %v2582_v46, %v2179_v33  ;;  %v2191_v62 = vmul.f32 %v2584_v48, %v2098_v1  ;;  %vm2196_vm6 = vweird.f32 %v2584_v48 }
 0x97e   : > { %v2188_v44 = vsel %vm2185_vm5, %v2187_v55, %v2183_v59  ;;  %vm2197_vm8 = vmor %vm2195_vm7, %vm2196_vm6 }
 0x97f   : > { %v2225_v36 = vsel %vm2067_vm10, %v3509_v53, %v2188_v44  ;;  %v2192_v40 = vsub.f32 1.0, %v2191_v62 }
 0x980   : > { %2234 = vst.msk [vmem:[%s3492_s25 + $0x28] sm:$0xff] %vm2228_vm13, %v2225_v36 }
 0x981   : > { %v2193_v52 = vmul.f32 %v2584_v48, %v2192_v40 }
 0x983   : > { %v2194_v45 = vadd.f32 %v2584_v48, %v2193_v52 }
 0x985   : > { %v2198_v51 = vsel %vm2197_vm8, %v2584_v48, %v2194_v45 }
 0x986   : > { %v2203_v4 = vsel %vm2200_vm9, %v2202_v60, %v2198_v51 }
 0x987   : > { %v2226_v14 = vsel %vm2067_vm10, %v3513_v16, %v2203_v4 }
 0x988   : > { %2235 = vst.msk [vmem:[%s3492_s25 + $0x30] sm:$0xff] %vm2228_vm13, %v2226_v14 }
 0x9a4   : > { %v2062_v63 = vpop.f32.mrf.mxu1 }
 0x9a5   : > { %v2063_v0 = vadd.f32 %v2062_v63, %v3479_v24 }
 0x9a7   : > { %v2420_v9 = vmul.f32 -1.442695, %v2063_v0 }
 0x9a9   : > { %2585 = vpow2.f32 %v2420_v9 }
 0x9af   : > { %v2586_v5 = vpop.eup %2585 }
 0x9b0   : > { %v2099_v3 = vadd.f32 1.0, %v2586_v5 }
 0x9b2   : > { %2587 = vrcp.f32 %v2099_v3  ;;  %v2216_v54 = vand.u32 2147483648, %v2099_v3  ;;  %v2214_v41 = vand.u32 2147483647, %v2099_v3  ;;  %vm2210_vm14 = vweird.f32 %v2099_v3 }
 0x9b4   : > { %v2217_v6 = vor.u32 1.1754944e-38, %v2216_v54  ;;  %vm2215_vm12 = vcmp.eq.f32.partialorder %v2214_v41, 8.507059e+37 }
 0x9b8   : > { %v2588_v22 = vpop.eup %2587 }
 0x9b9   : > { %v2206_v11 = vmul.f32 %v2588_v22, %v2099_v3  ;;  %vm2211_vm2 = vweird.f32 %v2588_v22 }
 0x9ba   : > { %vm2212_vm11 = vmor %vm2210_vm14, %vm2211_vm2 }
 0x9bb   : > { %v2207_v53 = vsub.f32 1.0, %v2206_v11 }
 0x9bd   : > { %v2208_v15 = vmul.f32 %v2588_v22, %v2207_v53 }
 0x9bf   : > { %v2209_v28 = vadd.f32 %v2588_v22, %v2208_v15 }
 0x9c1   : > { %v2213_v58 = vsel %vm2212_vm11, %v2588_v22, %v2209_v28 }
 0x9c2   : > { %v2218_v24 = vsel %vm2215_vm12, %v2217_v6, %v2213_v58 }
 0x9c3   : > { %v2227_v17 = vsel %vm2067_vm10, %v2063_v0, %v2218_v24 }
 0x9c4   : > { %2236 = vst.msk [vmem:[%s3492_s25 + $0x38] sm:$0xff] %vm2228_vm13, %v2227_v17 }
 0x9c5 PF: > { %s22_s21 = sadd.s32 1, %s2596_s21  }
 0x9c6   : > { %p19_p4 = scmp.ge.s32.totalorder %s22_s21, 4  }
 0x9c8   :  { %21 = sbr.rel (!%p19_p4) target bundleno = 1 (0x1), region = 98 }

</bundles_post_ra>
